<compile_context>
chip_gen: v7x
topology: tpu7x:2x2x1
jax: 0.10.0
libtpu: 0.0.40
codegen_flags: <defaults>
</compile_context>

<pallas_src>
import functools

import numpy as np
import jax
import jax.numpy as jnp
from jax import lax
from jax.experimental import pallas as pl
from jax.experimental.pallas import tpu as pltpu


def _round_up(x, m):
    return (x + m - 1) // m * m


def _oihw_to_mat(w):
    """(Cout, Cin, kh, kw) OIHW -> (kh*kw*Cin, Cout) matching NHWC im2col order."""
    cout, cin, kh, kw = w.shape
    return jnp.transpose(w, (2, 3, 1, 0)).reshape(kh * kw * cin, cout)


# ---------------------------------------------------------------------------
# Pallas kernel 1: out = act(A @ W), bf16 operands, f32 accumulation
# ---------------------------------------------------------------------------
def _mm_act_kernel(a_ref, w_ref, o_ref, *, act):
    acc = jnp.dot(a_ref[...], w_ref[...], preferred_element_type=jnp.float32)
    if act == "relu":
        acc = jnp.maximum(acc, 0.0)
    elif act == "tanh":
        acc = jnp.tanh(acc)
    o_ref[...] = acc.astype(o_ref.dtype)


def matmul_act(a, w, act="none", tm=512, out_dtype=jnp.float32):
    """act(a @ w) on the MXU.  a:(M,K), w:(K,N), bias-free.

    - operands cast to bf16 (MXU native), f32 accumulator,
    - K and N zero-padded to multiples of 128 (lane-dense loads & stores),
    - M padded to the row tile (no degenerate single-block fallback).
    """
    M, K = a.shape
    Kw, N = w.shape
    assert K == Kw
    Np = _round_up(max(N, 128), 128)
    Kp = _round_up(max(K, 128), 128)
    Mp = _round_up(M, 8)
    tm = min(tm, Mp)
    Mp = _round_up(Mp, tm)

    a_p = jnp.pad(a, ((0, Mp - M), (0, Kp - K))).astype(jnp.bfloat16)
    w_p = jnp.pad(w, ((0, Kp - K), (0, Np - N))).astype(jnp.bfloat16)

    out = pl.pallas_call(
        functools.partial(_mm_act_kernel, act=act),
        out_shape=jax.ShapeDtypeStruct((Mp, Np), out_dtype),
        grid_spec=pltpu.PrefetchScalarGridSpec(
            num_scalar_prefetch=0,
            grid=(Mp // tm,),
            in_specs=[
                pl.BlockSpec((tm, Kp), lambda i: (i, 0)),
                pl.BlockSpec((Kp, Np), lambda i: (0, 0)),
            ],
            out_specs=pl.BlockSpec((tm, Np), lambda i: (i, 0)),
        ),
        compiler_params=pltpu.CompilerParams(
            dimension_semantics=("parallel",)),
    )(a_p, w_p)
    return out[:M, :N]


# ---------------------------------------------------------------------------
# Pallas kernel 2: fused tail  tanh( relu(A @ W1) @ W2 )  (tiny M = batch)
# ---------------------------------------------------------------------------
def _tail_kernel(a_ref, w1_ref, w2_ref, o_ref):
    h = jnp.dot(a_ref[...], w1_ref[...], preferred_element_type=jnp.float32)
    h = jnp.maximum(h, 0.0)
    y = jnp.dot(h.astype(w2_ref.dtype), w2_ref[...],
                preferred_element_type=jnp.float32)
    o_ref[...] = jnp.tanh(y).astype(o_ref.dtype)


def fused_tail(a, w1, w2, out_dtype=jnp.float32):
    """Single pallas_call for: 4x4 'valid' conv (as matmul) -> ReLU -> 1x1 conv -> Tanh."""
    M, K1 = a.shape
    H = w1.shape[1]
    N = w2.shape[1]
    Mp = _round_up(M, 8)
    Hp = _round_up(max(H, 128), 128)
    Np = _round_up(max(N, 128), 128)

    a_p = jnp.pad(a, ((0, Mp - M), (0, 0))).astype(jnp.bfloat16)
    w1_p = jnp.pad(w1, ((0, 0), (0, Hp - H))).astype(jnp.bfloat16)
    w2_p = jnp.pad(w2, ((0, Hp - H), (0, Np - N))).astype(jnp.bfloat16)

    out = pl.pallas_call(
        _tail_kernel,
        out_shape=jax.ShapeDtypeStruct((Mp, Np), out_dtype),
        grid_spec=pltpu.PrefetchScalarGridSpec(
            num_scalar_prefetch=0,
            grid=(1,),
            in_specs=[
                pl.BlockSpec((Mp, K1), lambda i: (0, 0)),
                pl.BlockSpec((K1, Hp), lambda i: (0, 0)),
                pl.BlockSpec((Hp, Np), lambda i: (0, 0)),
            ],
            out_specs=pl.BlockSpec((Mp, Np), lambda i: (0, 0)),
        ),
    )(a_p, w1_p, w2_p)
    return out[:M, :N]


# ---------------------------------------------------------------------------
# Conv2d (NHWC, bias-free) = transpose-free im2col + Pallas matmul
# ---------------------------------------------------------------------------
def conv2d_nhwc(x, w, stride, padding, act="relu", tm=512):
    """x: (B, H, W, C) NHWC, w: (Cout, Cin, kh, kw) OIHW -> (B, Ho, Wo, Cout)."""
    B, H, W, C = x.shape
    cout, cin, kh, kw = w.shape
    assert C == cin
    sh, sw = stride
    ph, pw = padding
    if ph or pw:
        x = jnp.pad(x, ((0, 0), (ph, ph), (pw, pw), (0, 0)))
    Hp, Wp = H + 2 * ph, W + 2 * pw
    Ho = (Hp - kh) // sh + 1
    Wo = (Wp - kw) // sw + 1

    # TODO(synk): patch gather stays as XLA glue (strided slices + concat in
    # NHWC, no transposes); a fully in-kernel gather needs manual halo DMAs.
    cols = [x[:, i:i + sh * Ho:sh, j:j + sw * Wo:sw, :]
            for i in range(kh) for j in range(kw)]
    patches = jnp.concatenate(cols, axis=-1).reshape(B * Ho * Wo, kh * kw * C)

    y = matmul_act(patches, _oihw_to_mat(w), act=act, tm=tm)
    return y.reshape(B, Ho, Wo, cout)


# ---------------------------------------------------------------------------
# Encoder forward (Pallas path)
# ---------------------------------------------------------------------------
def encoder_forward(params, x):
    """x: (B, cin, H, W) NCHW -> (B, cout), matching Encoder.forward."""
    h = jnp.transpose(x, (0, 2, 3, 1))              # single boundary transpose
    for w in params["down"]:                        # 4x4 / s2 / p1 convs + ReLU
        h = conv2d_nhwc(h, w, (2, 2), (1, 1), act="relu")
    B = h.shape[0]
    # Spatial map is now kh x kw of the 'valid' conv, so its im2col is a pure
    # reshape; fuse conv5 + ReLU + 1x1 conv + Tanh into one Pallas kernel.
    assert h.shape[1] == params["w_mid"].shape[2] and h.shape[2] == params["w_mid"].shape[3]
    a = h.reshape(B, -1)
    return fused_tail(a, _oihw_to_mat(params["w_mid"]),
                      _oihw_to_mat(params["w_out"]))


# ---------------------------------------------------------------------------
# Pure-JAX reference (for correctness check)
# ---------------------------------------------------------------------------
def encoder_reference(params, x, match_bf16=True):
    """match_bf16=True mimics the kernel recipe (bf16 MXU operands, f32 acc)."""
    if match_bf16:
        cast = lambda v: v.astype(jnp.bfloat16)
        kwargs = dict(preferred_element_type=jnp.float32)
    else:
        cast = lambda v: v
        kwargs = dict(precision=lax.Precision.HIGHEST)

    def conv(h, w, stride, padding):
        return lax.conv_general_dilated(
            cast(h), cast(w), window_strides=stride,
            padding=[(padding[0], padding[0]), (padding[1], padding[1])],
            dimension_numbers=("NCHW", "OIHW", "NCHW"), **kwargs)

    h = x
    for w in params["down"]:
        h = jnp.maximum(conv(h, w, (2, 2), (1, 1)), 0.0)
    h = jnp.maximum(conv(h, params["w_mid"], (1, 1), (0, 0)), 0.0)
    y = jnp.tanh(conv(h, params["w_out"], (1, 1), (0, 0)))
    return y.reshape(x.shape[0], -1)


# ---------------------------------------------------------------------------
# Deterministic parameter init (shapes follow Encoder.__init__, bias=False)
# ---------------------------------------------------------------------------
def init_params(key, cin, cout, in_size, nf):
    def w_init(k, shape):
        fan_in = int(np.prod(shape[1:]))
        return jax.random.normal(k, shape, jnp.float32) / np.sqrt(fan_in)

    n_extra = int(np.log2(in_size // 64))           # add_downsample
    chans = [cin, nf, nf * 2, nf * 4, nf * 8] + [nf * 8] * n_extra
    keys = jax.random.split(key, len(chans) + 1)
    down = [w_init(keys[i], (chans[i + 1], chans[i], 4, 4))
            for i in range(len(chans) - 1)]
    w_mid = w_init(keys[-2], (nf * 8, nf * 8, 4, 4))   # 4x4 s1 p0 conv
    w_out = w_init(keys[-1], (cout, nf * 8, 1, 1))     # 1x1 conv
    return {"down": down, "w_mid": w_mid, "w_out": w_out}


if __name__ == "__main__":
    # Small config: in_size=64 is the architectural minimum (4 stride-2 convs
    # -> 4x4, then the 4x4 valid conv -> 1x1). batch=2, cin=3, nf=16, cout=32.
    B, CIN, IN_SIZE = 2, 3, 64
    COUT, NF = 32, 16

    key = jax.random.PRNGKey(0)
    kx, kp = jax.random.split(key)
    x = jax.random.normal(kx, (B, CIN, IN_SIZE, IN_SIZE), jnp.float32)
    params = init_params(kp, CIN, COUT, IN_SIZE, NF)

    fwd = jax.jit(encoder_forward)
    out = fwd(params, x)
    jax.block_until_ready(out)

    assert out.shape == (B, COUT), out.shape
    assert bool(jnp.all(jnp.isfinite(out)))

    # Exact-recipe reference (bf16 operands / f32 accumulation) -> tight check.
    ref_bf16 = encoder_reference(params, x, match_bf16=True)
    np.testing.assert_allclose(np.asarray(out), np.asarray(ref_bf16),
                               atol=5e-3, rtol=5e-3)
    # Full-f32 reference -> loose sanity check (bf16 operand rounding drift).
    ref_f32 = encoder_reference(params, x, match_bf16=False)
    np.testing.assert_allclose(np.asarray(out), np.asarray(ref_f32),
                               atol=5e-2, rtol=5e-2)

    print("KERNEL_OK")
</pallas_src>

<mosaic_0001>
module attributes {stable_mosaic.version = 11 : i64} {
  func.func @_mm_act_kernel(%arg0: i32, %arg1: memref<512x128xbf16, #tpu.memory_space<vmem>>, %arg2: memref<128x128xbf16, #tpu.memory_space<vmem>>, %arg3: memref<512x128xf32, #tpu.memory_space<vmem>>) attributes {dimension_semantics = [#tpu.dimension_semantics<parallel>], iteration_bounds = array<i64: 4>, scalar_prefetch = 0 : i64, scratch_operands = 0 : i64, tpu.core_type = #tpu.core_type<tc>, window_params = [{transform_indices = @transform_0, window_bounds = array<i64: 512, 128>}, {pipeline_mode = #tpu.pipeline_mode<synchronous>, transform_indices = @transform_1, window_bounds = array<i64: 128, 128>}, {transform_indices = @transform_2, window_bounds = array<i64: 512, 128>}]} {
    %c0 = arith.constant 0 : index
    %c0_0 = arith.constant 0 : index
    %0 = vector.load %arg1[%c0, %c0_0] : memref<512x128xbf16, #tpu.memory_space<vmem>>, vector<512x128xbf16>
    %c0_1 = arith.constant 0 : index
    %c0_2 = arith.constant 0 : index
    %1 = vector.load %arg2[%c0_1, %c0_2] : memref<128x128xbf16, #tpu.memory_space<vmem>>, vector<128x128xbf16>
    %cst = arith.constant dense<0.000000e+00> : vector<512x128xf32>
    %2 = tpu.matmul %0, %1, %cst {dimension_numbers = #tpu.dot_dimension_numbers<[1], [0], [0], [1], [0, 0, 1, 1], [], []>} : vector<512x128xbf16>, vector<128x128xbf16>, vector<512x128xf32> -> vector<512x128xf32>
    %cst_3 = arith.constant 0.000000e+00 : f32
    %3 = vector.broadcast %cst_3 : f32 to vector<512x128xf32>
    %4 = arith.maximumf %2, %3 : vector<512x128xf32>
    %c0_4 = arith.constant 0 : index
    %c0_5 = arith.constant 0 : index
    %5 = vector.load %arg3[%c0_4, %c0_5] : memref<512x128xf32, #tpu.memory_space<vmem>>, vector<512x128xf32>
    tpu.vector_store %arg3[%c0_4, %c0_5], %4 {strides = array<i32>} : memref<512x128xf32, #tpu.memory_space<vmem>>, vector<512x128xf32>,
    return
  }
  func.func @transform_0(%arg0: i32) -> (i32, i32) {
    %c0_i32 = arith.constant 0 : i32
    %c0_i32_0 = arith.constant 0 : i32
    return %arg0, %c0_i32 : i32, i32
  }
  func.func @transform_1(%arg0: i32) -> (i32, i32) {
    %c0_i32 = arith.constant 0 : i32
    %c0_i32_0 = arith.constant 0 : i32
    %c0_i32_1 = arith.constant 0 : i32
    return %c0_i32, %c0_i32_0 : i32, i32
  }
  func.func @transform_2(%arg0: i32) -> (i32, i32) {
    %c0_i32 = arith.constant 0 : i32
    %c0_i32_0 = arith.constant 0 : i32
    return %arg0, %c0_i32 : i32, i32
  }
}

module attributes {stable_mosaic.version = 11 : i64} {
  func.func @_mm_act_kernel(%arg0: i32, %arg1: memref<512x256xbf16, #tpu.memory_space<vmem>>, %arg2: memref<256x128xbf16, #tpu.memory_space<vmem>>, %arg3: memref<512x128xf32, #tpu.memory_space<vmem>>) attributes {dimension_semantics = [#tpu.dimension_semantics<parallel>], iteration_bounds = array<i64: 1>, scalar_prefetch = 0 : i64, scratch_operands = 0 : i64, tpu.core_type = #tpu.core_type<tc>, window_params = [{transform_indices = @transform_0, window_bounds = array<i64: 512, 256>}, {pipeline_mode = #tpu.pipeline_mode<synchronous>, transform_indices = @transform_1, window_bounds = array<i64: 256, 128>}, {transform_indices = @transform_2, window_bounds = array<i64: 512, 128>}]} {
    %c0 = arith.constant 0 : index
    %c0_0 = arith.constant 0 : index
    %0 = vector.load %arg1[%c0, %c0_0] : memref<512x256xbf16, #tpu.memory_space<vmem>>, vector<512x256xbf16>
    %c0_1 = arith.constant 0 : index
    %c0_2 = arith.constant 0 : index
    %1 = vector.load %arg2[%c0_1, %c0_2] : memref<256x128xbf16, #tpu.memory_space<vmem>>, vector<256x128xbf16>
    %cst = arith.constant dense<0.000000e+00> : vector<512x128xf32>
    %2 = tpu.matmul %0, %1, %cst {dimension_numbers = #tpu.dot_dimension_numbers<[1], [0], [0], [1], [0, 0, 1, 1], [], []>} : vector<512x256xbf16>, vector<256x128xbf16>, vector<512x128xf32> -> vector<512x128xf32>
    %cst_3 = arith.constant 0.000000e+00 : f32
    %3 = vector.broadcast %cst_3 : f32 to vector<512x128xf32>
    %4 = arith.maximumf %2, %3 : vector<512x128xf32>
    %c0_4 = arith.constant 0 : index
    %c0_5 = arith.constant 0 : index
    %5 = vector.load %arg3[%c0_4, %c0_5] : memref<512x128xf32, #tpu.memory_space<vmem>>, vector<512x128xf32>
    tpu.vector_store %arg3[%c0_4, %c0_5], %4 {strides = array<i32>} : memref<512x128xf32, #tpu.memory_space<vmem>>, vector<512x128xf32>,
    return
  }
  func.func @transform_0(%arg0: i32) -> (i32, i32) {
    %c0_i32 = arith.constant 0 : i32
    %c0_i32_0 = arith.constant 0 : i32
    return %arg0, %c0_i32 : i32, i32
  }
  func.func @transform_1(%arg0: i32) -> (i32, i32) {
    %c0_i32 = arith.constant 0 : i32
    %c0_i32_0 = arith.constant 0 : i32
    %c0_i32_1 = arith.constant 0 : i32
    return %c0_i32, %c0_i32_0 : i32, i32
  }
  func.func @transform_2(%arg0: i32) -> (i32, i32) {
    %c0_i32 = arith.constant 0 : i32
    %c0_i32_0 = arith.constant 0 : i32
    return %arg0, %c0_i32 : i32, i32
  }
}

module attributes {stable_mosaic.version = 11 : i64} {
  func.func @_mm_act_kernel(%arg0: i32, %arg1: memref<128x512xbf16, #tpu.memory_space<vmem>>, %arg2: memref<512x128xbf16, #tpu.memory_space<vmem>>, %arg3: memref<128x128xf32, #tpu.memory_space<vmem>>) attributes {dimension_semantics = [#tpu.dimension_semantics<parallel>], iteration_bounds = array<i64: 1>, scalar_prefetch = 0 : i64, scratch_operands = 0 : i64, tpu.core_type = #tpu.core_type<tc>, window_params = [{transform_indices = @transform_0, window_bounds = array<i64: 128, 512>}, {pipeline_mode = #tpu.pipeline_mode<synchronous>, transform_indices = @transform_1, window_bounds = array<i64: 512, 128>}, {transform_indices = @transform_2, window_bounds = array<i64: 128, 128>}]} {
    %c0 = arith.constant 0 : index
    %c0_0 = arith.constant 0 : index
    %0 = vector.load %arg1[%c0, %c0_0] : memref<128x512xbf16, #tpu.memory_space<vmem>>, vector<128x512xbf16>
    %c0_1 = arith.constant 0 : index
    %c0_2 = arith.constant 0 : index
    %1 = vector.load %arg2[%c0_1, %c0_2] : memref<512x128xbf16, #tpu.memory_space<vmem>>, vector<512x128xbf16>
    %cst = arith.constant dense<0.000000e+00> : vector<128x128xf32>
    %2 = tpu.matmul %0, %1, %cst {dimension_numbers = #tpu.dot_dimension_numbers<[1], [0], [0], [1], [0, 0, 1, 1], [], []>} : vector<128x512xbf16>, vector<512x128xbf16>, vector<128x128xf32> -> vector<128x128xf32>
    %cst_3 = arith.constant 0.000000e+00 : f32
    %3 = vector.broadcast %cst_3 : f32 to vector<128x128xf32>
    %4 = arith.maximumf %2, %3 : vector<128x128xf32>
    %c0_4 = arith.constant 0 : index
    %c0_5 = arith.constant 0 : index
    %5 = vector.load %arg3[%c0_4, %c0_5] : memref<128x128xf32, #tpu.memory_space<vmem>>, vector<128x128xf32>
    tpu.vector_store %arg3[%c0_4, %c0_5], %4 {strides = array<i32>} : memref<128x128xf32, #tpu.memory_space<vmem>>, vector<128x128xf32>,
    return
  }
  func.func @transform_0(%arg0: i32) -> (i32, i32) {
    %c0_i32 = arith.constant 0 : i32
    %c0_i32_0 = arith.constant 0 : i32
    return %arg0, %c0_i32 : i32, i32
  }
  func.func @transform_1(%arg0: i32) -> (i32, i32) {
    %c0_i32 = arith.constant 0 : i32
    %c0_i32_0 = arith.constant 0 : i32
    %c0_i32_1 = arith.constant 0 : i32
    return %c0_i32, %c0_i32_0 : i32, i32
  }
  func.func @transform_2(%arg0: i32) -> (i32, i32) {
    %c0_i32 = arith.constant 0 : i32
    %c0_i32_0 = arith.constant 0 : i32
    return %arg0, %c0_i32 : i32, i32
  }
}

module attributes {stable_mosaic.version = 11 : i64} {
  func.func @_mm_act_kernel(%arg0: i32, %arg1: memref<32x1024xbf16, #tpu.memory_space<vmem>>, %arg2: memref<1024x128xbf16, #tpu.memory_space<vmem>>, %arg3: memref<32x128xf32, #tpu.memory_space<vmem>>) attributes {dimension_semantics = [#tpu.dimension_semantics<parallel>], iteration_bounds = array<i64: 1>, scalar_prefetch = 0 : i64, scratch_operands = 0 : i64, tpu.core_type = #tpu.core_type<tc>, window_params = [{transform_indices = @transform_0, window_bounds = array<i64: 32, 1024>}, {pipeline_mode = #tpu.pipeline_mode<synchronous>, transform_indices = @transform_1, window_bounds = array<i64: 1024, 128>}, {transform_indices = @transform_2, window_bounds = array<i64: 32, 128>}]} {
    %c0 = arith.constant 0 : index
    %c0_0 = arith.constant 0 : index
    %0 = vector.load %arg1[%c0, %c0_0] : memref<32x1024xbf16, #tpu.memory_space<vmem>>, vector<32x1024xbf16>
    %c0_1 = arith.constant 0 : index
    %c0_2 = arith.constant 0 : index
    %1 = vector.load %arg2[%c0_1, %c0_2] : memref<1024x128xbf16, #tpu.memory_space<vmem>>, vector<1024x128xbf16>
    %cst = arith.constant dense<0.000000e+00> : vector<32x128xf32>
    %2 = tpu.matmul %0, %1, %cst {dimension_numbers = #tpu.dot_dimension_numbers<[1], [0], [0], [1], [0, 0, 1, 1], [], []>} : vector<32x1024xbf16>, vector<1024x128xbf16>, vector<32x128xf32> -> vector<32x128xf32>
    %cst_3 = arith.constant 0.000000e+00 : f32
    %3 = vector.broadcast %cst_3 : f32 to vector<32x128xf32>
    %4 = arith.maximumf %2, %3 : vector<32x128xf32>
    %c0_4 = arith.constant 0 : index
    %c0_5 = arith.constant 0 : index
    %5 = vector.load %arg3[%c0_4, %c0_5] : memref<32x128xf32, #tpu.memory_space<vmem>>, vector<32x128xf32>
    tpu.vector_store %arg3[%c0_4, %c0_5], %4 {strides = array<i32>} : memref<32x128xf32, #tpu.memory_space<vmem>>, vector<32x128xf32>,
    return
  }
  func.func @transform_0(%arg0: i32) -> (i32, i32) {
    %c0_i32 = arith.constant 0 : i32
    %c0_i32_0 = arith.constant 0 : i32
    return %arg0, %c0_i32 : i32, i32
  }
  func.func @transform_1(%arg0: i32) -> (i32, i32) {
    %c0_i32 = arith.constant 0 : i32
    %c0_i32_0 = arith.constant 0 : i32
    %c0_i32_1 = arith.constant 0 : i32
    return %c0_i32, %c0_i32_0 : i32, i32
  }
  func.func @transform_2(%arg0: i32) -> (i32, i32) {
    %c0_i32 = arith.constant 0 : i32
    %c0_i32_0 = arith.constant 0 : i32
    return %arg0, %c0_i32 : i32, i32
  }
}

module attributes {stable_mosaic.version = 11 : i64} {
  func.func @_tail_kernel(%arg0: i32, %arg1: memref<8x2048xbf16, #tpu.memory_space<vmem>>, %arg2: memref<2048x128xbf16, #tpu.memory_space<vmem>>, %arg3: memref<128x128xbf16, #tpu.memory_space<vmem>>, %arg4: memref<8x128xf32, #tpu.memory_space<vmem>>) attributes {dimension_semantics = [#tpu.dimension_semantics<arbitrary>], iteration_bounds = array<i64: 1>, scalar_prefetch = 0 : i64, scratch_operands = 0 : i64, tpu.core_type = #tpu.core_type<tc>, window_params = [{pipeline_mode = #tpu.pipeline_mode<synchronous>, transform_indices = @transform_0, window_bounds = array<i64: 8, 2048>}, {pipeline_mode = #tpu.pipeline_mode<synchronous>, transform_indices = @transform_1, window_bounds = array<i64: 2048, 128>}, {pipeline_mode = #tpu.pipeline_mode<synchronous>, transform_indices = @transform_2, window_bounds = array<i64: 128, 128>}, {pipeline_mode = #tpu.pipeline_mode<synchronous>, transform_indices = @transform_3, window_bounds = array<i64: 8, 128>}]} {
    %c0 = arith.constant 0 : index
    %c0_0 = arith.constant 0 : index
    %0 = vector.load %arg1[%c0, %c0_0] : memref<8x2048xbf16, #tpu.memory_space<vmem>>, vector<8x2048xbf16>
    %c0_1 = arith.constant 0 : index
    %c0_2 = arith.constant 0 : index
    %1 = vector.load %arg2[%c0_1, %c0_2] : memref<2048x128xbf16, #tpu.memory_space<vmem>>, vector<2048x128xbf16>
    %cst = arith.constant dense<0.000000e+00> : vector<8x128xf32>
    %2 = tpu.matmul %0, %1, %cst {dimension_numbers = #tpu.dot_dimension_numbers<[1], [0], [0], [1], [0, 0, 1, 1], [], []>} : vector<8x2048xbf16>, vector<2048x128xbf16>, vector<8x128xf32> -> vector<8x128xf32>
    %cst_3 = arith.constant 0.000000e+00 : f32
    %3 = vector.broadcast %cst_3 : f32 to vector<8x128xf32>
    %4 = arith.maximumf %2, %3 : vector<8x128xf32>
    %5 = arith.truncf %4 : vector<8x128xf32> to vector<8x128xbf16>
    %c0_4 = arith.constant 0 : index
    %c0_5 = arith.constant 0 : index
    %6 = vector.load %arg3[%c0_4, %c0_5] : memref<128x128xbf16, #tpu.memory_space<vmem>>, vector<128x128xbf16>
    %cst_6 = arith.constant dense<0.000000e+00> : vector<8x128xf32>
    %7 = tpu.matmul %5, %6, %cst_6 {dimension_numbers = #tpu.dot_dimension_numbers<[1], [0], [0], [1], [0, 0, 1, 1], [], []>} : vector<8x128xbf16>, vector<128x128xbf16>, vector<8x128xf32> -> vector<8x128xf32>
    %8 = math.tanh %7 : vector<8x128xf32>
    %c0_7 = arith.constant 0 : index
    %c0_8 = arith.constant 0 : index
    %9 = vector.load %arg4[%c0_7, %c0_8] : memref<8x128xf32, #tpu.memory_space<vmem>>, vector<8x128xf32>
    tpu.vector_store %arg4[%c0_7, %c0_8], %8 {strides = array<i32>} : memref<8x128xf32, #tpu.memory_space<vmem>>, vector<8x128xf32>,
    return
  }
  func.func @transform_0(%arg0: i32) -> (i32, i32) {
    %c0_i32 = arith.constant 0 : i32
    %c0_i32_0 = arith.constant 0 : i32
    %c0_i32_1 = arith.constant 0 : i32
    return %c0_i32, %c0_i32_0 : i32, i32
  }
  func.func @transform_1(%arg0: i32) -> (i32, i32) {
    %c0_i32 = arith.constant 0 : i32
    %c0_i32_0 = arith.constant 0 : i32
    %c0_i32_1 = arith.constant 0 : i32
    return %c0_i32, %c0_i32_0 : i32, i32
  }
  func.func @transform_2(%arg0: i32) -> (i32, i32) {
    %c0_i32 = arith.constant 0 : i32
    %c0_i32_0 = arith.constant 0 : i32
    %c0_i32_1 = arith.constant 0 : i32
    return %c0_i32, %c0_i32_0 : i32, i32
  }
  func.func @transform_3(%arg0: i32) -> (i32, i32) {
    %c0_i32 = arith.constant 0 : i32
    %c0_i32_0 = arith.constant 0 : i32
    %c0_i32_1 = arith.constant 0 : i32
    return %c0_i32, %c0_i32_0 : i32, i32
  }
}

</mosaic_0001>

<bundles_post_ra>
// kernel: encoder_forward.5
= control target key start
LH: loop header
LB: loop body
LE: loop exit
PB: predicated region body
PF: predicated region fallthrough
CT: control target
= control target key end

     0   :  { %s1199_s9 = smov 0   ;;  %s1344_s0 = inlined_call_operand.vmem [shape: bf16[2048,128], index: 0, kind: input, shape index: {}]   ;;  %s1345_s1 = inlined_call_operand.vmem [shape: bf16[128,128], index: 1, kind: input, shape index: {}]   ;;  %s1346_s2 = inlined_call_operand.vmem [shape: f32[2048,128], index: 2, kind: output, shape index: {}]  }
   0x1 LB: > { %s941_s10 = sadd.s32 4294967295, %s1182_s9   ;;  %p945_p0 = scmp.ge.s32.totalorder %s1182_s9, 1  ;;  %s1182_s9 = sphi %s1199_s9, %s12_s9  }
   0x2   : > { %p113_p1 = scmp.lt.s32.totalorder %s1182_s9, 5 }
   0x4   : > { %p114_p2 = pnand %p945_p0, %p113_p1 }
   0x5   : > { %v1136_v0 = vld [vmem:[%s1345_s1] sm:$0xff] (!%p114_p2)   ;;  %s946_s13 = sshll.u32 (!%p114_p2), %s941_s10, 6  ;;  %v1137_v1 = vld [vmem:[%s1345_s1 + $0x8] sm:$0xff] (!%p114_p2)   ;;  %v1138_v2 = vld [vmem:[%s1345_s1 + $0x10] sm:$0xff] (!%p114_p2)  }
   0x6   : > { %117 = sbr.rel (%p114_p2) target bundleno = 312 (0x138), region = 28  ;;  %p136_p3 = scmp.lt.s32.totalorder (!%p114_p2), %s946_s13, 255  ;;  %1032 = vmatprep.subr.bf16.mxu0 (!%p114_p2), %v1136_v0  ;;  %1112 = vmatprep.subr.bf16.mxu1 (!%p114_p2), %v1136_v0  ;;  %v1139_v3 = vld [vmem:[%s1345_s1 + $0x18] sm:$0xff] (!%p114_p2)   ;;  %v1140_v6 = vld [vmem:[%s1345_s1 + $0x20] sm:$0xff] (!%p114_p2)   ;;  %v1141_v7 = vld [vmem:[%s1345_s1 + $0x28] sm:$0xff] (!%p114_p2)  }
   0x7   : > { %1033 = vmatpush3.bf16.msra.mxu0 (!%p114_p2), %v1136_v0  ;;  %1120 = vmatpush3.bf16.msra.mxu1 (!%p114_p2), %v1136_v0  ;;  %v1142_v8 = vld [vmem:[%s1345_s1 + $0x30] sm:$0xff] (!%p114_p2)   ;;  %v1143_v9 = vld [vmem:[%s1345_s1 + $0x38] sm:$0xff] (!%p114_p2)  }
   0x8   : > { %1034 = vmatprep.subr.bf16.mxu0 (!%p114_p2), %v1137_v1  ;;  %1113 = vmatprep.subr.bf16.mxu1 (!%p114_p2), %v1137_v1 }
   0xb   : > { %1035 = vmatpush3.bf16.msra.mxu0 (!%p114_p2), %v1137_v1  ;;  %1121 = vmatpush3.bf16.msra.mxu1 (!%p114_p2), %v1137_v1 }
   0xc   : > { %1036 = vmatprep.subr.bf16.mxu0 (!%p114_p2), %v1138_v2  ;;  %1114 = vmatprep.subr.bf16.mxu1 (!%p114_p2), %v1138_v2 }
   0xd   : > { %s1348_s13 = smov (!%p136_p3, %s946_s13), 255 }
   0xe   : > { %s947_s18 = sshll.u32 %s1348_s13, 2  ;;  %s949_s4 = sshll.u32 %s1348_s13, 3 }
   0xf   : > { %s1222_s21 = scalar_lea.vmem %s1344_s0, %s947_s18  ;;  %1037 = vmatpush3.bf16.msra.mxu0 %v1138_v2  ;;  %1122 = vmatpush3.bf16.msra.mxu1 %v1138_v2  ;;  %s1275_s7 = scalar_lea.vmem %s1346_s2, %s949_s4 }
  0x10   : > { %v1144_v4 = vld [vmem:[%s1222_s21] sm:$0xff]   ;;  %1038 = vmatprep.subr.bf16.mxu0 %v1139_v3  ;;  %1115 = vmatprep.subr.bf16.mxu1 %v1139_v3  ;;  %v1146_v10 = vld [vmem:[%s1222_s21 + $0x8] sm:$0xff]   ;;  %v1148_v12 = vld [vmem:[%s1222_s21 + $0x10] sm:$0xff]  }
  0x11   : > { %v1145_v5 = vld [vmem:[%s1222_s21 + $0x80] sm:$0xff]   ;;  %1048 = vmatprep.mubr.bf16.mxu0 %v1144_v4  ;;  %v1147_v11 = vld [vmem:[%s1222_s21 + $0x88] sm:$0xff]   ;;  %v1149_v13 = vld [vmem:[%s1222_s21 + $0x90] sm:$0xff]  }
  0x12   : > { %1080 = vmatprep.mubr.bf16.mxu1 %v1145_v5  ;;  %v1150_v14 = vld [vmem:[%s1222_s21 + $0x18] sm:$0xff]   ;;  %v1152_v16 = vld [vmem:[%s1222_s21 + $0x20] sm:$0xff]   ;;  %v1154_v18 = vld [vmem:[%s1222_s21 + $0x28] sm:$0xff]  }
  0x13   : > { %1039 = vmatpush3.bf16.msra.mxu0 %v1139_v3  ;;  %1123 = vmatpush3.bf16.msra.mxu1 %v1139_v3  ;;  %v1151_v15 = vld [vmem:[%s1222_s21 + $0x98] sm:$0xff]   ;;  %v1153_v17 = vld [vmem:[%s1222_s21 + $0xa0] sm:$0xff]   ;;  %v1155_v19 = vld [vmem:[%s1222_s21 + $0xa8] sm:$0xff]  }
  0x14   : > { %1040 = vmatprep.subr.bf16.mxu0 %v1140_v6  ;;  %1116 = vmatprep.subr.bf16.mxu1 %v1140_v6  ;;  %v1156_v20 = vld [vmem:[%s1222_s21 + $0x30] sm:$0xff]   ;;  %v1158_v22 = vld [vmem:[%s1222_s21 + $0x38] sm:$0xff]   ;;  %v1160_v24 = vld [vmem:[%s1222_s21 + $0x40] sm:$0xff]  }
  0x15   : > { %v1157_v21 = vld [vmem:[%s1222_s21 + $0xb0] sm:$0xff]   ;;  %v1159_v23 = vld [vmem:[%s1222_s21 + $0xb8] sm:$0xff]   ;;  %v1161_v25 = vld [vmem:[%s1222_s21 + $0xc0] sm:$0xff]  }
  0x16   : > { %v1162_v26 = vld [vmem:[%s1222_s21 + $0x48] sm:$0xff]   ;;  %v1164_v28 = vld [vmem:[%s1222_s21 + $0x50] sm:$0xff]   ;;  %v1166_v30 = vld [vmem:[%s1222_s21 + $0x58] sm:$0xff]  }
  0x17   : > { %1041 = vmatpush3.bf16.msra.mxu0 %v1140_v6  ;;  %1124 = vmatpush3.bf16.msra.mxu1 %v1140_v6  ;;  %v1163_v27 = vld [vmem:[%s1222_s21 + $0xc8] sm:$0xff]   ;;  %v1165_v29 = vld [vmem:[%s1222_s21 + $0xd0] sm:$0xff]   ;;  %v1167_v31 = vld [vmem:[%s1222_s21 + $0xd8] sm:$0xff]  }
  0x18   : > { %1042 = vmatprep.subr.bf16.mxu0 %v1141_v7  ;;  %1117 = vmatprep.subr.bf16.mxu1 %v1141_v7  ;;  %v1168_v32 = vld [vmem:[%s1222_s21 + $0x60] sm:$0xff]   ;;  %v1170_v34 = vld [vmem:[%s1222_s21 + $0x68] sm:$0xff]   ;;  %v1172_v36 = vld [vmem:[%s1222_s21 + $0x70] sm:$0xff]  }
  0x19   : > { %v1169_v33 = vld [vmem:[%s1222_s21 + $0xe0] sm:$0xff]   ;;  %v1171_v35 = vld [vmem:[%s1222_s21 + $0xe8] sm:$0xff]   ;;  %v1173_v37 = vld [vmem:[%s1222_s21 + $0xf0] sm:$0xff]  }
  0x1a   : > { %v1174_v38 = vld [vmem:[%s1222_s21 + $0x78] sm:$0xff]  }
  0x1b   : > { %1043 = vmatpush3.bf16.msra.mxu0 %v1141_v7  ;;  %1125 = vmatpush3.bf16.msra.mxu1 %v1141_v7  ;;  %v1175_v39 = vld [vmem:[%s1222_s21 + $0xf8] sm:$0xff]  }
  0x1c   : > { %1044 = vmatprep.subr.bf16.mxu0 %v1142_v8  ;;  %1118 = vmatprep.subr.bf16.mxu1 %v1142_v8 }
  0x1f   : > { %1045 = vmatpush3.bf16.msra.mxu0 %v1142_v8  ;;  %1126 = vmatpush3.bf16.msra.mxu1 %v1142_v8 }
  0x20   : > { %1046 = vmatprep.subr.bf16.mxu0 %v1143_v9  ;;  %1119 = vmatprep.subr.bf16.mxu1 %v1143_v9 }
  0x23   : > { %1047 = vmatpush3.bf16.msra.mxu0 %v1143_v9  ;;  %1127 = vmatpush3.bf16.msra.mxu1 %v1143_v9 }
  0x26   : > { %1049 = vmatmul.mubr.bf16.vlgmr.msra.gmra.mrb[0].mxu0 %v1146_v10  ;;  %1081 = vmatmul.mubr.bf16.vlgmr.msra.gmra.mrb[0].mxu1 %v1147_v11 }
  0x27   : > { %1052 = vmatprep.mubr.bf16.mxu0 %v1148_v12  ;;  %1084 = vmatprep.mubr.bf16.mxu1 %v1149_v13 }
  0x2e   : > { %1053 = vmatmul.mubr.bf16.gmra.mrb[4].mxu0 %v1150_v14  ;;  %1085 = vmatmul.mubr.bf16.gmra.mrb[4].mxu1 %v1151_v15 }
  0x2f   : > { %1056 = vmatprep.mubr.bf16.mxu0 %v1152_v16  ;;  %1088 = vmatprep.mubr.bf16.mxu1 %v1153_v17 }
  0x36   : > { %1057 = vmatmul.mubr.bf16.gmra.mrb[8].mxu0 %v1154_v18  ;;  %1089 = vmatmul.mubr.bf16.gmra.mrb[8].mxu1 %v1155_v19 }
  0x37   : > { %1060 = vmatprep.mubr.bf16.mxu0 %v1156_v20  ;;  %1092 = vmatprep.mubr.bf16.mxu1 %v1157_v21 }
  0x3e   : > { %1061 = vmatmul.mubr.bf16.gmra.mrb[12].mxu0 %v1158_v22  ;;  %1093 = vmatmul.mubr.bf16.gmra.mrb[12].mxu1 %v1159_v23 }
  0x3f   : > { %1064 = vmatprep.mubr.bf16.mxu0 %v1160_v24  ;;  %1096 = vmatprep.mubr.bf16.mxu1 %v1161_v25 }
  0x46   : > { %1065 = vmatmul.mubr.bf16.gmra.mrb[16].mxu0 %v1162_v26  ;;  %1097 = vmatmul.mubr.bf16.gmra.mrb[16].mxu1 %v1163_v27 }
  0x47   : > { %1068 = vmatprep.mubr.bf16.mxu0 %v1164_v28  ;;  %1100 = vmatprep.mubr.bf16.mxu1 %v1165_v29 }
  0x4e   : > { %1069 = vmatmul.mubr.bf16.gmra.mrb[20].mxu0 %v1166_v30  ;;  %1101 = vmatmul.mubr.bf16.gmra.mrb[20].mxu1 %v1167_v31 }
  0x4f   : > { %1072 = vmatprep.mubr.bf16.mxu0 %v1168_v32  ;;  %1104 = vmatprep.mubr.bf16.mxu1 %v1169_v33 }
  0x56   : > { %1073 = vmatmul.mubr.bf16.gmra.mrb[24].mxu0 %v1170_v34  ;;  %1105 = vmatmul.mubr.bf16.gmra.mrb[24].mxu1 %v1171_v35 }
  0x57   : > { %1076 = vmatprep.mubr.bf16.mxu0 %v1172_v36  ;;  %1108 = vmatprep.mubr.bf16.mxu1 %v1173_v37 }
  0x5e   : > { %1077 = vmatmul.mubr.bf16.gmra.mrb[28].mxu0 %v1174_v38  ;;  %1109 = vmatmul.mubr.bf16.gmra.mrb[28].mxu1 %v1175_v39 }
  0xf9   : > { %v1050_v40 = vpop.f32.mrb[0].mxu0  ;;  %v1082_v41 = vpop.f32.mrb[0].mxu1 }
  0xfa   : > { %v759_v42 = vmax.f32 %v1050_v40, 0.0  ;;  %v791_v43 = vmax.f32 %v1082_v41, 0.0  ;;  %v502_v44 = vpop.f32.mrb[1].mxu0  ;;  %v630_v45 = vpop.f32.mrb[1].mxu1 }
  0xfb   : > { %v757_v46 = vmax.f32 %v502_v44, 0.0  ;;  %v789_v47 = vmax.f32 %v630_v45, 0.0  ;;  %v1051_v48 = vpop.f32.mrb[2].mxu0  ;;  %v1083_v49 = vpop.f32.mrb[2].mxu1 }
  0xfc   : > { %823 = vst [vmem:[%s1275_s7 + $0x10] sm:$0xff] %v759_v42  ;;  %855 = vst [vmem:[%s1275_s7 + $0x110] sm:$0xff] %v791_v43  ;;  %v760_v50 = vmax.f32 %v1051_v48, 0.0  ;;  %v792_v51 = vmax.f32 %v1083_v49, 0.0  ;;  %v505_v52 = vpop.f32.mrb[3].mxu0  ;;  %v633_v53 = vpop.f32.mrb[3].mxu1 }
  0xfd   : > { %821 = vst [vmem:[%s1275_s7] sm:$0xff] %v757_v46  ;;  %853 = vst [vmem:[%s1275_s7 + $0x100] sm:$0xff] %v789_v47  ;;  %v758_v54 = vmax.f32 %v505_v52, 0.0  ;;  %v790_v55 = vmax.f32 %v633_v53, 0.0 }
  0xfe   : > { %824 = vst [vmem:[%s1275_s7 + $0x18] sm:$0xff] %v760_v50  ;;  %856 = vst [vmem:[%s1275_s7 + $0x118] sm:$0xff] %v792_v51 }
  0xff   : > { %822 = vst [vmem:[%s1275_s7 + $0x8] sm:$0xff] %v758_v54  ;;  %854 = vst [vmem:[%s1275_s7 + $0x108] sm:$0xff] %v790_v55 }
 0x101   : > { %v1054_v56 = vpop.f32.mrb[4].mxu0  ;;  %v1086_v57 = vpop.f32.mrb[4].mxu1 }
 0x102   : > { %v763_v58 = vmax.f32 %v1054_v56, 0.0  ;;  %v795_v59 = vmax.f32 %v1086_v57, 0.0  ;;  %v518_v60 = vpop.f32.mrb[5].mxu0  ;;  %v646_v61 = vpop.f32.mrb[5].mxu1 }
 0x103   : > { %v761_v62 = vmax.f32 %v518_v60, 0.0  ;;  %v793_v63 = vmax.f32 %v646_v61, 0.0  ;;  %v1055_v0 = vpop.f32.mrb[6].mxu0  ;;  %v1087_v1 = vpop.f32.mrb[6].mxu1 }
 0x104   : > { %827 = vst [vmem:[%s1275_s7 + $0x30] sm:$0xff] %v763_v58  ;;  %859 = vst [vmem:[%s1275_s7 + $0x130] sm:$0xff] %v795_v59  ;;  %v764_v2 = vmax.f32 %v1055_v0, 0.0  ;;  %v796_v3 = vmax.f32 %v1087_v1, 0.0  ;;  %v521_v4 = vpop.f32.mrb[7].mxu0  ;;  %v649_v5 = vpop.f32.mrb[7].mxu1 }
 0x105   : > { %825 = vst [vmem:[%s1275_s7 + $0x20] sm:$0xff] %v761_v62  ;;  %857 = vst [vmem:[%s1275_s7 + $0x120] sm:$0xff] %v793_v63  ;;  %v762_v6 = vmax.f32 %v521_v4, 0.0  ;;  %v794_v7 = vmax.f32 %v649_v5, 0.0 }
 0x106   : > { %828 = vst [vmem:[%s1275_s7 + $0x38] sm:$0xff] %v764_v2  ;;  %860 = vst [vmem:[%s1275_s7 + $0x138] sm:$0xff] %v796_v3 }
 0x107   : > { %826 = vst [vmem:[%s1275_s7 + $0x28] sm:$0xff] %v762_v6  ;;  %858 = vst [vmem:[%s1275_s7 + $0x128] sm:$0xff] %v794_v7 }
 0x109   : > { %v1058_v8 = vpop.f32.mrb[8].mxu0  ;;  %v1090_v9 = vpop.f32.mrb[8].mxu1 }
 0x10a   : > { %v767_v10 = vmax.f32 %v1058_v8, 0.0  ;;  %v799_v11 = vmax.f32 %v1090_v9, 0.0  ;;  %v534_v12 = vpop.f32.mrb[9].mxu0  ;;  %v662_v13 = vpop.f32.mrb[9].mxu1 }
 0x10b   : > { %v765_v14 = vmax.f32 %v534_v12, 0.0  ;;  %v797_v15 = vmax.f32 %v662_v13, 0.0  ;;  %v1059_v16 = vpop.f32.mrb[10].mxu0  ;;  %v1091_v17 = vpop.f32.mrb[10].mxu1 }
 0x10c   : > { %831 = vst [vmem:[%s1275_s7 + $0x50] sm:$0xff] %v767_v10  ;;  %863 = vst [vmem:[%s1275_s7 + $0x150] sm:$0xff] %v799_v11  ;;  %v768_v18 = vmax.f32 %v1059_v16, 0.0  ;;  %v800_v19 = vmax.f32 %v1091_v17, 0.0  ;;  %v537_v20 = vpop.f32.mrb[11].mxu0  ;;  %v665_v21 = vpop.f32.mrb[11].mxu1 }
 0x10d   : > { %829 = vst [vmem:[%s1275_s7 + $0x40] sm:$0xff] %v765_v14  ;;  %861 = vst [vmem:[%s1275_s7 + $0x140] sm:$0xff] %v797_v15  ;;  %v766_v22 = vmax.f32 %v537_v20, 0.0  ;;  %v798_v23 = vmax.f32 %v665_v21, 0.0 }
 0x10e   : > { %832 = vst [vmem:[%s1275_s7 + $0x58] sm:$0xff] %v768_v18  ;;  %864 = vst [vmem:[%s1275_s7 + $0x158] sm:$0xff] %v800_v19 }
 0x10f   : > { %830 = vst [vmem:[%s1275_s7 + $0x48] sm:$0xff] %v766_v22  ;;  %862 = vst [vmem:[%s1275_s7 + $0x148] sm:$0xff] %v798_v23 }
 0x111   : > { %v1062_v24 = vpop.f32.mrb[12].mxu0  ;;  %v1094_v25 = vpop.f32.mrb[12].mxu1 }
 0x112   : > { %v771_v26 = vmax.f32 %v1062_v24, 0.0  ;;  %v803_v27 = vmax.f32 %v1094_v25, 0.0  ;;  %v550_v28 = vpop.f32.mrb[13].mxu0  ;;  %v678_v29 = vpop.f32.mrb[13].mxu1 }
 0x113   : > { %v769_v30 = vmax.f32 %v550_v28, 0.0  ;;  %v801_v31 = vmax.f32 %v678_v29, 0.0  ;;  %v1063_v32 = vpop.f32.mrb[14].mxu0  ;;  %v1095_v33 = vpop.f32.mrb[14].mxu1 }
 0x114   : > { %835 = vst [vmem:[%s1275_s7 + $0x70] sm:$0xff] %v771_v26  ;;  %867 = vst [vmem:[%s1275_s7 + $0x170] sm:$0xff] %v803_v27  ;;  %v772_v34 = vmax.f32 %v1063_v32, 0.0  ;;  %v804_v35 = vmax.f32 %v1095_v33, 0.0  ;;  %v553_v36 = vpop.f32.mrb[15].mxu0  ;;  %v681_v37 = vpop.f32.mrb[15].mxu1 }
 0x115   : > { %833 = vst [vmem:[%s1275_s7 + $0x60] sm:$0xff] %v769_v30  ;;  %865 = vst [vmem:[%s1275_s7 + $0x160] sm:$0xff] %v801_v31  ;;  %v770_v38 = vmax.f32 %v553_v36, 0.0  ;;  %v802_v39 = vmax.f32 %v681_v37, 0.0 }
 0x116   : > { %836 = vst [vmem:[%s1275_s7 + $0x78] sm:$0xff] %v772_v34  ;;  %868 = vst [vmem:[%s1275_s7 + $0x178] sm:$0xff] %v804_v35 }
 0x117   : > { %834 = vst [vmem:[%s1275_s7 + $0x68] sm:$0xff] %v770_v38  ;;  %866 = vst [vmem:[%s1275_s7 + $0x168] sm:$0xff] %v802_v39 }
 0x119   : > { %v1066_v40 = vpop.f32.mrb[16].mxu0  ;;  %v1098_v41 = vpop.f32.mrb[16].mxu1 }
 0x11a   : > { %v775_v42 = vmax.f32 %v1066_v40, 0.0  ;;  %v807_v43 = vmax.f32 %v1098_v41, 0.0  ;;  %v566_v44 = vpop.f32.mrb[17].mxu0  ;;  %v694_v45 = vpop.f32.mrb[17].mxu1 }
 0x11b   : > { %v773_v46 = vmax.f32 %v566_v44, 0.0  ;;  %v805_v47 = vmax.f32 %v694_v45, 0.0  ;;  %v1067_v48 = vpop.f32.mrb[18].mxu0  ;;  %v1099_v49 = vpop.f32.mrb[18].mxu1 }
 0x11c   : > { %839 = vst [vmem:[%s1275_s7 + $0x90] sm:$0xff] %v775_v42  ;;  %871 = vst [vmem:[%s1275_s7 + $0x190] sm:$0xff] %v807_v43  ;;  %v776_v50 = vmax.f32 %v1067_v48, 0.0  ;;  %v808_v51 = vmax.f32 %v1099_v49, 0.0  ;;  %v569_v52 = vpop.f32.mrb[19].mxu0  ;;  %v697_v53 = vpop.f32.mrb[19].mxu1 }
 0x11d   : > { %837 = vst [vmem:[%s1275_s7 + $0x80] sm:$0xff] %v773_v46  ;;  %869 = vst [vmem:[%s1275_s7 + $0x180] sm:$0xff] %v805_v47  ;;  %v774_v54 = vmax.f32 %v569_v52, 0.0  ;;  %v806_v55 = vmax.f32 %v697_v53, 0.0 }
 0x11e   : > { %840 = vst [vmem:[%s1275_s7 + $0x98] sm:$0xff] %v776_v50  ;;  %872 = vst [vmem:[%s1275_s7 + $0x198] sm:$0xff] %v808_v51 }
 0x11f   : > { %838 = vst [vmem:[%s1275_s7 + $0x88] sm:$0xff] %v774_v54  ;;  %870 = vst [vmem:[%s1275_s7 + $0x188] sm:$0xff] %v806_v55 }
 0x121   : > { %v1070_v56 = vpop.f32.mrb[20].mxu0  ;;  %v1102_v57 = vpop.f32.mrb[20].mxu1 }
 0x122   : > { %v779_v58 = vmax.f32 %v1070_v56, 0.0  ;;  %v811_v59 = vmax.f32 %v1102_v57, 0.0  ;;  %v582_v60 = vpop.f32.mrb[21].mxu0  ;;  %v710_v61 = vpop.f32.mrb[21].mxu1 }
 0x123   : > { %v777_v62 = vmax.f32 %v582_v60, 0.0  ;;  %v809_v63 = vmax.f32 %v710_v61, 0.0  ;;  %v1071_v0 = vpop.f32.mrb[22].mxu0  ;;  %v1103_v1 = vpop.f32.mrb[22].mxu1 }
 0x124   : > { %843 = vst [vmem:[%s1275_s7 + $0xb0] sm:$0xff] %v779_v58  ;;  %875 = vst [vmem:[%s1275_s7 + $0x1b0] sm:$0xff] %v811_v59  ;;  %v780_v2 = vmax.f32 %v1071_v0, 0.0  ;;  %v812_v3 = vmax.f32 %v1103_v1, 0.0  ;;  %v585_v4 = vpop.f32.mrb[23].mxu0  ;;  %v713_v5 = vpop.f32.mrb[23].mxu1 }
 0x125   : > { %841 = vst [vmem:[%s1275_s7 + $0xa0] sm:$0xff] %v777_v62  ;;  %873 = vst [vmem:[%s1275_s7 + $0x1a0] sm:$0xff] %v809_v63  ;;  %v778_v6 = vmax.f32 %v585_v4, 0.0  ;;  %v810_v7 = vmax.f32 %v713_v5, 0.0 }
 0x126   : > { %844 = vst [vmem:[%s1275_s7 + $0xb8] sm:$0xff] %v780_v2  ;;  %876 = vst [vmem:[%s1275_s7 + $0x1b8] sm:$0xff] %v812_v3 }
 0x127   : > { %842 = vst [vmem:[%s1275_s7 + $0xa8] sm:$0xff] %v778_v6  ;;  %874 = vst [vmem:[%s1275_s7 + $0x1a8] sm:$0xff] %v810_v7 }
 0x129   : > { %v1074_v8 = vpop.f32.mrb[24].mxu0  ;;  %v1106_v9 = vpop.f32.mrb[24].mxu1 }
 0x12a   : > { %v783_v10 = vmax.f32 %v1074_v8, 0.0  ;;  %v815_v11 = vmax.f32 %v1106_v9, 0.0  ;;  %v598_v12 = vpop.f32.mrb[25].mxu0  ;;  %v726_v13 = vpop.f32.mrb[25].mxu1 }
 0x12b   : > { %v781_v14 = vmax.f32 %v598_v12, 0.0  ;;  %v813_v15 = vmax.f32 %v726_v13, 0.0  ;;  %v1075_v16 = vpop.f32.mrb[26].mxu0  ;;  %v1107_v17 = vpop.f32.mrb[26].mxu1 }
 0x12c   : > { %847 = vst [vmem:[%s1275_s7 + $0xd0] sm:$0xff] %v783_v10  ;;  %879 = vst [vmem:[%s1275_s7 + $0x1d0] sm:$0xff] %v815_v11  ;;  %v784_v18 = vmax.f32 %v1075_v16, 0.0  ;;  %v816_v19 = vmax.f32 %v1107_v17, 0.0  ;;  %v601_v20 = vpop.f32.mrb[27].mxu0  ;;  %v729_v21 = vpop.f32.mrb[27].mxu1 }
 0x12d   : > { %845 = vst [vmem:[%s1275_s7 + $0xc0] sm:$0xff] %v781_v14  ;;  %877 = vst [vmem:[%s1275_s7 + $0x1c0] sm:$0xff] %v813_v15  ;;  %v782_v22 = vmax.f32 %v601_v20, 0.0  ;;  %v814_v23 = vmax.f32 %v729_v21, 0.0 }
 0x12e   : > { %848 = vst [vmem:[%s1275_s7 + $0xd8] sm:$0xff] %v784_v18  ;;  %880 = vst [vmem:[%s1275_s7 + $0x1d8] sm:$0xff] %v816_v19 }
 0x12f   : > { %846 = vst [vmem:[%s1275_s7 + $0xc8] sm:$0xff] %v782_v22  ;;  %878 = vst [vmem:[%s1275_s7 + $0x1c8] sm:$0xff] %v814_v23 }
 0x131   : > { %v1078_v24 = vpop.f32.mrb[28].mxu0  ;;  %v1110_v25 = vpop.f32.mrb[28].mxu1 }
 0x132   : > { %v787_v26 = vmax.f32 %v1078_v24, 0.0  ;;  %v819_v27 = vmax.f32 %v1110_v25, 0.0  ;;  %v614_v28 = vpop.f32.mrb[29].mxu0  ;;  %v742_v29 = vpop.f32.mrb[29].mxu1 }
 0x133   : > { %v785_v30 = vmax.f32 %v614_v28, 0.0  ;;  %v817_v31 = vmax.f32 %v742_v29, 0.0  ;;  %v1079_v32 = vpop.f32.mrb[30].mxu0  ;;  %v1111_v33 = vpop.f32.mrb[30].mxu1 }
 0x134   : > { %851 = vst [vmem:[%s1275_s7 + $0xf0] sm:$0xff] %v787_v26  ;;  %883 = vst [vmem:[%s1275_s7 + $0x1f0] sm:$0xff] %v819_v27  ;;  %v788_v34 = vmax.f32 %v1079_v32, 0.0  ;;  %v820_v35 = vmax.f32 %v1111_v33, 0.0  ;;  %v617_v36 = vpop.f32.mrb[31].mxu0  ;;  %v745_v37 = vpop.f32.mrb[31].mxu1 }
 0x135   : > { %849 = vst [vmem:[%s1275_s7 + $0xe0] sm:$0xff] %v785_v30  ;;  %881 = vst [vmem:[%s1275_s7 + $0x1e0] sm:$0xff] %v817_v31  ;;  %v786_v38 = vmax.f32 %v617_v36, 0.0  ;;  %v818_v39 = vmax.f32 %v745_v37, 0.0 }
 0x136   : > { %852 = vst [vmem:[%s1275_s7 + $0xf8] sm:$0xff] %v788_v34  ;;  %884 = vst [vmem:[%s1275_s7 + $0x1f8] sm:$0xff] %v820_v35 }
 0x137   : > { %850 = vst [vmem:[%s1275_s7 + $0xe8] sm:$0xff] %v786_v38  ;;  %882 = vst [vmem:[%s1275_s7 + $0x1e8] sm:$0xff] %v818_v39 }
 0x138 PF: > { %s12_s9 = sadd.s32 1, %s1182_s9  }
 0x139   : > { %p9_p4 = scmp.ge.s32.totalorder %s12_s9, 6  }
 0x13b   :  { %11 = sbr.rel (!%p9_p4) target bundleno = 1 (0x1), region = 58 }

// kernel: encoder_forward.6
= control target key start
LH: loop header
LB: loop body
LE: loop exit
PB: predicated region body
PF: predicated region fallthrough
CT: control target
= control target key end

     0   :  { %v1170_v0 = vmov 0   ;;  %s1650_s1 = inlined_call_operand.vmem [shape: bf16[256,128], index: 1, kind: input, shape index: {}]   ;;  %s1651_s0 = inlined_call_operand.vmem [shape: bf16[512,256], index: 0, kind: input, shape index: {}]   ;;  %s1652_s2 = inlined_call_operand.vmem [shape: f32[512,128], index: 2, kind: output, shape index: {}]  }
   0x1   :  { %524 = vmatprep.subr.bf16.mxu0 %v1170_v0  ;;  %1025 = vmatprep.subr.bf16.mxu1 %v1170_v0  ;;  %v1058_v1 = vld [vmem:[%s1650_s1] sm:$0xff]   ;;  %v1059_v2 = vld [vmem:[%s1650_s1 + $0x8] sm:$0xff]   ;;  %v1060_v3 = vld [vmem:[%s1650_s1 + $0x10] sm:$0xff]  }
   0x2   :  { %525 = vmatpush1.bf16.msra.mxu0 %v1058_v1  ;;  %1041 = vmatpush1.bf16.msra.mxu1 %v1058_v1  ;;  %v1061_v4 = vld [vmem:[%s1650_s1 + $0x18] sm:$0xff]   ;;  %v1062_v5 = vld [vmem:[%s1650_s1 + $0x20] sm:$0xff]   ;;  %v1063_v7 = vld [vmem:[%s1650_s1 + $0x28] sm:$0xff]  }
   0x3   :  { %526 = vmatprep.subr.bf16.mxu0 %v1170_v0  ;;  %1026 = vmatprep.subr.bf16.mxu1 %v1170_v0  ;;  %v1076_v6 = vld [vmem:[%s1651_s0 + $0x4] ss:$8 sps:$4 sm:$0xff]   ;;  %v1064_v9 = vld [vmem:[%s1650_s1 + $0x30] sm:$0xff]   ;;  %v1065_v10 = vld [vmem:[%s1650_s1 + $0x38] sm:$0xff]  }
   0x4   :  { %v1079_v8 = vld [vmem:[%s1651_s0 + $0x104] ss:$8 sps:$4 sm:$0xff]   ;;  %556 = vmatprep.mubr.bf16.mxu0 %v1076_v6  ;;  %v1068_v13 = vld [vmem:[%s1650_s1 + $0x50] sm:$0xff]   ;;  %v1069_v14 = vld [vmem:[%s1650_s1 + $0x58] sm:$0xff]  }
   0x5   :  { %684 = vmatprep.mubr.bf16.mxu1 %v1079_v8  ;;  %v1066_v11 = vld [vmem:[%s1650_s1 + $0x40] sm:$0xff]   ;;  %v1067_v12 = vld [vmem:[%s1650_s1 + $0x48] sm:$0xff]   ;;  %v1072_v17 = vld [vmem:[%s1650_s1 + $0x70] sm:$0xff]  }
   0x6   :  { %527 = vmatpush1.bf16.msra.mxu0 %v1059_v2  ;;  %1042 = vmatpush1.bf16.msra.mxu1 %v1059_v2  ;;  %v1070_v15 = vld [vmem:[%s1650_s1 + $0x60] sm:$0xff]   ;;  %v1071_v16 = vld [vmem:[%s1650_s1 + $0x68] sm:$0xff]   ;;  %v1073_v18 = vld [vmem:[%s1650_s1 + $0x78] sm:$0xff]  }
   0x7   :  { %528 = vmatprep.subr.bf16.mxu0 %v1170_v0  ;;  %1027 = vmatprep.subr.bf16.mxu1 %v1170_v0  ;;  %v1074_v19 = vld [vmem:[%s1651_s0] ss:$8 sps:$4 sm:$0xff]   ;;  %v1080_v21 = vld [vmem:[%s1651_s0 + $0x14] ss:$8 sps:$4 sm:$0xff]   ;;  %v1084_v23 = vld [vmem:[%s1651_s0 + $0x10] ss:$8 sps:$4 sm:$0xff]  }
   0x8   :  { %v1077_v20 = vld [vmem:[%s1651_s0 + $0x100] ss:$8 sps:$4 sm:$0xff]   ;;  %v1082_v22 = vld [vmem:[%s1651_s0 + $0x114] ss:$8 sps:$4 sm:$0xff]   ;;  %v1085_v24 = vld [vmem:[%s1651_s0 + $0x110] ss:$8 sps:$4 sm:$0xff]  }
   0x9   :  { %v1086_v25 = vld [vmem:[%s1651_s0 + $0x24] ss:$8 sps:$4 sm:$0xff]   ;;  %v1090_v27 = vld [vmem:[%s1651_s0 + $0x20] ss:$8 sps:$4 sm:$0xff]   ;;  %v1092_v29 = vld [vmem:[%s1651_s0 + $0x34] ss:$8 sps:$4 sm:$0xff]  }
   0xa   :  { %529 = vmatpush1.bf16.msra.mxu0 %v1060_v3  ;;  %1043 = vmatpush1.bf16.msra.mxu1 %v1060_v3  ;;  %v1088_v26 = vld [vmem:[%s1651_s0 + $0x124] ss:$8 sps:$4 sm:$0xff]   ;;  %v1091_v28 = vld [vmem:[%s1651_s0 + $0x120] ss:$8 sps:$4 sm:$0xff]   ;;  %v1094_v30 = vld [vmem:[%s1651_s0 + $0x134] ss:$8 sps:$4 sm:$0xff]  }
   0xb   :  { %530 = vmatprep.subr.bf16.mxu0 %v1170_v0  ;;  %1028 = vmatprep.subr.bf16.mxu1 %v1170_v0  ;;  %v1096_v31 = vld [vmem:[%s1651_s0 + $0x30] ss:$8 sps:$4 sm:$0xff]   ;;  %v1098_v33 = vld [vmem:[%s1651_s0 + $0x44] ss:$8 sps:$4 sm:$0xff]   ;;  %v1102_v35 = vld [vmem:[%s1651_s0 + $0x40] ss:$8 sps:$4 sm:$0xff]  }
   0xc   :  { %v1097_v32 = vld [vmem:[%s1651_s0 + $0x130] ss:$8 sps:$4 sm:$0xff]   ;;  %v1100_v34 = vld [vmem:[%s1651_s0 + $0x144] ss:$8 sps:$4 sm:$0xff]   ;;  %v1103_v36 = vld [vmem:[%s1651_s0 + $0x140] ss:$8 sps:$4 sm:$0xff]  }
   0xd   :  { %v1104_v37 = vld [vmem:[%s1651_s0 + $0x54] ss:$8 sps:$4 sm:$0xff]   ;;  %v1108_v39 = vld [vmem:[%s1651_s0 + $0x50] ss:$8 sps:$4 sm:$0xff]   ;;  %v1110_v41 = vld [vmem:[%s1651_s0 + $0x64] ss:$8 sps:$4 sm:$0xff]  }
   0xe   :  { %531 = vmatpush1.bf16.msra.mxu0 %v1061_v4  ;;  %1044 = vmatpush1.bf16.msra.mxu1 %v1061_v4  ;;  %v1106_v38 = vld [vmem:[%s1651_s0 + $0x154] ss:$8 sps:$4 sm:$0xff]   ;;  %v1109_v40 = vld [vmem:[%s1651_s0 + $0x150] ss:$8 sps:$4 sm:$0xff]   ;;  %v1112_v42 = vld [vmem:[%s1651_s0 + $0x164] ss:$8 sps:$4 sm:$0xff]  }
   0xf   :  { %532 = vmatprep.subr.bf16.mxu0 %v1170_v0  ;;  %1029 = vmatprep.subr.bf16.mxu1 %v1170_v0  ;;  %v1114_v43 = vld [vmem:[%s1651_s0 + $0x60] ss:$8 sps:$4 sm:$0xff]   ;;  %v1116_v45 = vld [vmem:[%s1651_s0 + $0x74] ss:$8 sps:$4 sm:$0xff]   ;;  %v1120_v47 = vld [vmem:[%s1651_s0 + $0x70] ss:$8 sps:$4 sm:$0xff]  }
  0x10   :  { %v1115_v44 = vld [vmem:[%s1651_s0 + $0x160] ss:$8 sps:$4 sm:$0xff]   ;;  %v1118_v46 = vld [vmem:[%s1651_s0 + $0x174] ss:$8 sps:$4 sm:$0xff]   ;;  %v1121_v48 = vld [vmem:[%s1651_s0 + $0x170] ss:$8 sps:$4 sm:$0xff]  }
  0x11   :  { %v1122_v49 = vld [vmem:[%s1651_s0 + $0x84] ss:$8 sps:$4 sm:$0xff]   ;;  %v1126_v51 = vld [vmem:[%s1651_s0 + $0x80] ss:$8 sps:$4 sm:$0xff]   ;;  %v1128_v53 = vld [vmem:[%s1651_s0 + $0x94] ss:$8 sps:$4 sm:$0xff]  }
  0x12   :  { %533 = vmatpush1.bf16.msra.mxu0 %v1062_v5  ;;  %1045 = vmatpush1.bf16.msra.mxu1 %v1062_v5  ;;  %v1124_v50 = vld [vmem:[%s1651_s0 + $0x184] ss:$8 sps:$4 sm:$0xff]   ;;  %v1127_v52 = vld [vmem:[%s1651_s0 + $0x180] ss:$8 sps:$4 sm:$0xff]   ;;  %v1130_v54 = vld [vmem:[%s1651_s0 + $0x194] ss:$8 sps:$4 sm:$0xff]  }
  0x13   :  { %534 = vmatprep.subr.bf16.mxu0 %v1170_v0  ;;  %1030 = vmatprep.subr.bf16.mxu1 %v1170_v0  ;;  %v1132_v55 = vld [vmem:[%s1651_s0 + $0x90] ss:$8 sps:$4 sm:$0xff]   ;;  %v1134_v57 = vld [vmem:[%s1651_s0 + $0xa4] ss:$8 sps:$4 sm:$0xff]   ;;  %v1138_v59 = vld [vmem:[%s1651_s0 + $0xa0] ss:$8 sps:$4 sm:$0xff]  }
  0x14   :  { %v1133_v56 = vld [vmem:[%s1651_s0 + $0x190] ss:$8 sps:$4 sm:$0xff]   ;;  %v1136_v58 = vld [vmem:[%s1651_s0 + $0x1a4] ss:$8 sps:$4 sm:$0xff]   ;;  %v1139_v60 = vld [vmem:[%s1651_s0 + $0x1a0] ss:$8 sps:$4 sm:$0xff]  }
  0x15   :  { %v1140_v61 = vld [vmem:[%s1651_s0 + $0xb4] ss:$8 sps:$4 sm:$0xff]   ;;  %v1144_v63 = vld [vmem:[%s1651_s0 + $0xb0] ss:$8 sps:$4 sm:$0xff]   ;;  %v1146_v1 = vld [vmem:[%s1651_s0 + $0xc4] ss:$8 sps:$4 sm:$0xff]  }
  0x16   :  { %535 = vmatpush1.bf16.msra.mxu0 %v1063_v7  ;;  %1046 = vmatpush1.bf16.msra.mxu1 %v1063_v7  ;;  %v1142_v62 = vld [vmem:[%s1651_s0 + $0x1b4] ss:$8 sps:$4 sm:$0xff]   ;;  %v1148_v2 = vld [vmem:[%s1651_s0 + $0x1c4] ss:$8 sps:$4 sm:$0xff]   ;;  %v1150_v3 = vld [vmem:[%s1651_s0 + $0xc0] ss:$8 sps:$4 sm:$0xff]  }
  0x17   :  { %536 = vmatprep.subr.bf16.mxu0 %v1170_v0  ;;  %1031 = vmatprep.subr.bf16.mxu1 %v1170_v0  ;;  %v1151_v4 = vld [vmem:[%s1651_s0 + $0x1c0] ss:$8 sps:$4 sm:$0xff]   ;;  %v1152_v5 = vld [vmem:[%s1651_s0 + $0xd4] ss:$8 sps:$4 sm:$0xff]   ;;  %v1156_v7 = vld [vmem:[%s1651_s0 + $0xd0] ss:$8 sps:$4 sm:$0xff]  }
  0x18   :  { %v1154_v6 = vld [vmem:[%s1651_s0 + $0x1d4] ss:$8 sps:$4 sm:$0xff]   ;;  %v1157_v8 = vld [vmem:[%s1651_s0 + $0x1d0] ss:$8 sps:$4 sm:$0xff]  }
  0x1a   :  { %537 = vmatpush1.bf16.msra.mxu0 %v1064_v9  ;;  %1047 = vmatpush1.bf16.msra.mxu1 %v1064_v9  ;;  %v1158_v9 = vld [vmem:[%s1651_s0 + $0xe4] ss:$8 sps:$4 sm:$0xff]  }
  0x1b   :  { %538 = vmatprep.subr.bf16.mxu0 %v1170_v0  ;;  %1032 = vmatprep.subr.bf16.mxu1 %v1170_v0 }
  0x1e   :  { %539 = vmatpush1.bf16.msra.mxu0 %v1065_v10  ;;  %1048 = vmatpush1.bf16.msra.mxu1 %v1065_v10  ;;  %v1160_v10 = vld [vmem:[%s1651_s0 + $0x1e4] ss:$8 sps:$4 sm:$0xff]  }
  0x1f   :  { %540 = vmatprep.subr.bf16.mxu0 %v1170_v0  ;;  %1033 = vmatprep.subr.bf16.mxu1 %v1170_v0 }
  0x22   :  { %541 = vmatpush1.bf16.msra.mxu0 %v1066_v11  ;;  %1049 = vmatpush1.bf16.msra.mxu1 %v1066_v11  ;;  %v1162_v11 = vld [vmem:[%s1651_s0 + $0xe0] ss:$8 sps:$4 sm:$0xff]  }
  0x23   :  { %542 = vmatprep.subr.bf16.mxu0 %v1170_v0  ;;  %1034 = vmatprep.subr.bf16.mxu1 %v1170_v0 }
  0x26   :  { %543 = vmatpush1.bf16.msra.mxu0 %v1067_v12  ;;  %1050 = vmatpush1.bf16.msra.mxu1 %v1067_v12  ;;  %v1163_v12 = vld [vmem:[%s1651_s0 + $0x1e0] ss:$8 sps:$4 sm:$0xff]  }
  0x27   :  { %544 = vmatprep.subr.bf16.mxu0 %v1170_v0  ;;  %1035 = vmatprep.subr.bf16.mxu1 %v1170_v0 }
  0x2a   :  { %545 = vmatpush1.bf16.msra.mxu0 %v1068_v13  ;;  %1051 = vmatpush1.bf16.msra.mxu1 %v1068_v13  ;;  %v1164_v13 = vld [vmem:[%s1651_s0 + $0xf4] ss:$8 sps:$4 sm:$0xff]  }
  0x2b   :  { %546 = vmatprep.subr.bf16.mxu0 %v1170_v0  ;;  %1036 = vmatprep.subr.bf16.mxu1 %v1170_v0 }
  0x2e   :  { %547 = vmatpush1.bf16.msra.mxu0 %v1069_v14  ;;  %1052 = vmatpush1.bf16.msra.mxu1 %v1069_v14  ;;  %v1166_v14 = vld [vmem:[%s1651_s0 + $0x1f4] ss:$8 sps:$4 sm:$0xff]  }
  0x2f   :  { %548 = vmatprep.subr.bf16.mxu0 %v1170_v0  ;;  %1037 = vmatprep.subr.bf16.mxu1 %v1170_v0 }
  0x32   :  { %549 = vmatpush1.bf16.msra.mxu0 %v1070_v15  ;;  %1053 = vmatpush1.bf16.msra.mxu1 %v1070_v15  ;;  %v1168_v15 = vld [vmem:[%s1651_s0 + $0xf0] ss:$8 sps:$4 sm:$0xff]  }
  0x33   :  { %550 = vmatprep.subr.bf16.mxu0 %v1170_v0  ;;  %1038 = vmatprep.subr.bf16.mxu1 %v1170_v0 }
  0x36   :  { %551 = vmatpush1.bf16.msra.mxu0 %v1071_v16  ;;  %1054 = vmatpush1.bf16.msra.mxu1 %v1071_v16  ;;  %v1169_v16 = vld [vmem:[%s1651_s0 + $0x1f0] ss:$8 sps:$4 sm:$0xff]  }
  0x37   :  { %552 = vmatprep.subr.bf16.mxu0 %v1170_v0  ;;  %1039 = vmatprep.subr.bf16.mxu1 %v1170_v0 }
  0x3a   :  { %553 = vmatpush1.bf16.msra.mxu0 %v1072_v17  ;;  %1055 = vmatpush1.bf16.msra.mxu1 %v1072_v17 }
  0x3b   :  { %554 = vmatprep.subr.bf16.mxu0 %v1170_v0  ;;  %1040 = vmatprep.subr.bf16.mxu1 %v1170_v0  ;;  %v1145_v0 = vld [vmem:[%s1651_s0 + $0x1b0] ss:$8 sps:$4 sm:$0xff]  }
  0x3e   :  { %555 = vmatpush1.bf16.msra.mxu0 %v1073_v18  ;;  %1056 = vmatpush1.bf16.msra.mxu1 %v1073_v18 }
  0x41   :  { %557 = vmatmul.mubr.bf16.vlgmr.msra.gmra.mrb[0].mxu0 %v1074_v19  ;;  %685 = vmatmul.mubr.bf16.vlgmr.msra.gmra.mrb[0].mxu1 %v1077_v20 }
  0x42   :  { %564 = vmatprep.mubr.bf16.mxu0 %v1080_v21  ;;  %692 = vmatprep.mubr.bf16.mxu1 %v1082_v22 }
  0x49   :  { %565 = vmatmul.mubr.bf16.gmra.mrb[4].mxu0 %v1084_v23  ;;  %693 = vmatmul.mubr.bf16.gmra.mrb[4].mxu1 %v1085_v24 }
  0x4a   :  { %572 = vmatprep.mubr.bf16.mxu0 %v1086_v25  ;;  %700 = vmatprep.mubr.bf16.mxu1 %v1088_v26 }
  0x51   :  { %573 = vmatmul.mubr.bf16.gmra.mrb[8].mxu0 %v1090_v27  ;;  %701 = vmatmul.mubr.bf16.gmra.mrb[8].mxu1 %v1091_v28 }
  0x52   :  { %580 = vmatprep.mubr.bf16.mxu0 %v1092_v29  ;;  %708 = vmatprep.mubr.bf16.mxu1 %v1094_v30 }
  0x59   :  { %581 = vmatmul.mubr.bf16.gmra.mrb[12].mxu0 %v1096_v31  ;;  %709 = vmatmul.mubr.bf16.gmra.mrb[12].mxu1 %v1097_v32 }
  0x5a   :  { %588 = vmatprep.mubr.bf16.mxu0 %v1098_v33  ;;  %716 = vmatprep.mubr.bf16.mxu1 %v1100_v34 }
  0x61   :  { %589 = vmatmul.mubr.bf16.gmra.mrb[16].mxu0 %v1102_v35  ;;  %717 = vmatmul.mubr.bf16.gmra.mrb[16].mxu1 %v1103_v36 }
  0x62   :  { %596 = vmatprep.mubr.bf16.mxu0 %v1104_v37  ;;  %724 = vmatprep.mubr.bf16.mxu1 %v1106_v38 }
  0x69   :  { %597 = vmatmul.mubr.bf16.gmra.mrb[20].mxu0 %v1108_v39  ;;  %725 = vmatmul.mubr.bf16.gmra.mrb[20].mxu1 %v1109_v40 }
  0x6a   :  { %604 = vmatprep.mubr.bf16.mxu0 %v1110_v41  ;;  %732 = vmatprep.mubr.bf16.mxu1 %v1112_v42 }
  0x71   :  { %605 = vmatmul.mubr.bf16.gmra.mrb[24].mxu0 %v1114_v43  ;;  %733 = vmatmul.mubr.bf16.gmra.mrb[24].mxu1 %v1115_v44 }
  0x72   :  { %612 = vmatprep.mubr.bf16.mxu0 %v1116_v45  ;;  %740 = vmatprep.mubr.bf16.mxu1 %v1118_v46 }
  0x79   :  { %613 = vmatmul.mubr.bf16.gmra.mrb[28].mxu0 %v1120_v47  ;;  %741 = vmatmul.mubr.bf16.gmra.mrb[28].mxu1 %v1121_v48 }
  0x7a   :  { %620 = vmatprep.mubr.bf16.mxu0 %v1122_v49  ;;  %748 = vmatprep.mubr.bf16.mxu1 %v1124_v50 }
  0x81   :  { %621 = vmatmul.mubr.bf16.gmra.mrb[32].mxu0 %v1126_v51  ;;  %749 = vmatmul.mubr.bf16.gmra.mrb[32].mxu1 %v1127_v52 }
  0x82   :  { %628 = vmatprep.mubr.bf16.mxu0 %v1128_v53  ;;  %756 = vmatprep.mubr.bf16.mxu1 %v1130_v54 }
  0x89   :  { %629 = vmatmul.mubr.bf16.gmra.mrb[36].mxu0 %v1132_v55  ;;  %757 = vmatmul.mubr.bf16.gmra.mrb[36].mxu1 %v1133_v56 }
  0x8a   :  { %636 = vmatprep.mubr.bf16.mxu0 %v1134_v57  ;;  %764 = vmatprep.mubr.bf16.mxu1 %v1136_v58 }
  0x91   :  { %637 = vmatmul.mubr.bf16.gmra.mrb[40].mxu0 %v1138_v59  ;;  %765 = vmatmul.mubr.bf16.gmra.mrb[40].mxu1 %v1139_v60 }
  0x92   :  { %644 = vmatprep.mubr.bf16.mxu0 %v1140_v61  ;;  %772 = vmatprep.mubr.bf16.mxu1 %v1142_v62 }
  0x99   :  { %645 = vmatmul.mubr.bf16.gmra.mrb[44].mxu0 %v1144_v63  ;;  %773 = vmatmul.mubr.bf16.gmra.mrb[44].mxu1 %v1145_v0 }
  0x9a   :  { %652 = vmatprep.mubr.bf16.mxu0 %v1146_v1  ;;  %780 = vmatprep.mubr.bf16.mxu1 %v1148_v2 }
  0xa1   :  { %653 = vmatmul.mubr.bf16.gmra.mrb[48].mxu0 %v1150_v3  ;;  %781 = vmatmul.mubr.bf16.gmra.mrb[48].mxu1 %v1151_v4 }
  0xa2   :  { %660 = vmatprep.mubr.bf16.mxu0 %v1152_v5  ;;  %788 = vmatprep.mubr.bf16.mxu1 %v1154_v6 }
  0xa9   :  { %661 = vmatmul.mubr.bf16.gmra.mrb[52].mxu0 %v1156_v7  ;;  %789 = vmatmul.mubr.bf16.gmra.mrb[52].mxu1 %v1157_v8 }
  0xaa   :  { %668 = vmatprep.mubr.bf16.mxu0 %v1158_v9  ;;  %796 = vmatprep.mubr.bf16.mxu1 %v1160_v10 }
  0xb1   :  { %669 = vmatmul.mubr.bf16.gmra.mrb[56].mxu0 %v1162_v11  ;;  %797 = vmatmul.mubr.bf16.gmra.mrb[56].mxu1 %v1163_v12 }
  0xb2   :  { %676 = vmatprep.mubr.bf16.mxu0 %v1164_v13  ;;  %804 = vmatprep.mubr.bf16.mxu1 %v1166_v14 }
  0xb9   :  { %677 = vmatmul.mubr.bf16.gmra.mrb[60].mxu0 %v1168_v15  ;;  %805 = vmatmul.mubr.bf16.gmra.mrb[60].mxu1 %v1169_v16 }
 0x114   :  { %v558_v17 = vpop.f32.mrb[0].mxu0  ;;  %v686_v18 = vpop.f32.mrb[0].mxu1 }
 0x115   :  { %v813_v19 = vmax.f32 %v558_v17, 0.0  ;;  %v845_v20 = vmax.f32 %v686_v18, 0.0  ;;  %v560_v21 = vpop.f32.mrb[1].mxu0  ;;  %v688_v22 = vpop.f32.mrb[1].mxu1 }
 0x116   :  { %v561_v23 = vpop.f32.mrb[2].mxu0  ;;  %v689_v24 = vpop.f32.mrb[2].mxu1 }
 0x117   :  { %877 = vst [vmem:[%s1652_s2] sm:$0xff] %v813_v19  ;;  %909 = vst [vmem:[%s1652_s2 + $0x100] sm:$0xff] %v845_v20  ;;  %v814_v25 = vmax.f32 %v561_v23, 0.0  ;;  %v846_v26 = vmax.f32 %v689_v24, 0.0  ;;  %v563_v27 = vpop.f32.mrb[3].mxu0  ;;  %v691_v28 = vpop.f32.mrb[3].mxu1 }
 0x119   :  { %878 = vst [vmem:[%s1652_s2 + $0x8] sm:$0xff] %v814_v25  ;;  %910 = vst [vmem:[%s1652_s2 + $0x108] sm:$0xff] %v846_v26 }
 0x11c   :  { %v566_v29 = vpop.f32.mrb[4].mxu0  ;;  %v694_v30 = vpop.f32.mrb[4].mxu1 }
 0x11d   :  { %v815_v31 = vmax.f32 %v566_v29, 0.0  ;;  %v847_v32 = vmax.f32 %v694_v30, 0.0  ;;  %v568_v33 = vpop.f32.mrb[5].mxu0  ;;  %v696_v34 = vpop.f32.mrb[5].mxu1 }
 0x11e   :  { %v569_v35 = vpop.f32.mrb[6].mxu0  ;;  %v697_v36 = vpop.f32.mrb[6].mxu1 }
 0x11f   :  { %879 = vst [vmem:[%s1652_s2 + $0x10] sm:$0xff] %v815_v31  ;;  %911 = vst [vmem:[%s1652_s2 + $0x110] sm:$0xff] %v847_v32  ;;  %v816_v37 = vmax.f32 %v569_v35, 0.0  ;;  %v848_v38 = vmax.f32 %v697_v36, 0.0  ;;  %v571_v39 = vpop.f32.mrb[7].mxu0  ;;  %v699_v40 = vpop.f32.mrb[7].mxu1 }
 0x121   :  { %880 = vst [vmem:[%s1652_s2 + $0x18] sm:$0xff] %v816_v37  ;;  %912 = vst [vmem:[%s1652_s2 + $0x118] sm:$0xff] %v848_v38 }
 0x124   :  { %v574_v41 = vpop.f32.mrb[8].mxu0  ;;  %v702_v42 = vpop.f32.mrb[8].mxu1 }
 0x125   :  { %v817_v43 = vmax.f32 %v574_v41, 0.0  ;;  %v849_v44 = vmax.f32 %v702_v42, 0.0  ;;  %v576_v45 = vpop.f32.mrb[9].mxu0  ;;  %v704_v46 = vpop.f32.mrb[9].mxu1 }
 0x126   :  { %v577_v47 = vpop.f32.mrb[10].mxu0  ;;  %v705_v48 = vpop.f32.mrb[10].mxu1 }
 0x127   :  { %881 = vst [vmem:[%s1652_s2 + $0x20] sm:$0xff] %v817_v43  ;;  %913 = vst [vmem:[%s1652_s2 + $0x120] sm:$0xff] %v849_v44  ;;  %v818_v49 = vmax.f32 %v577_v47, 0.0  ;;  %v850_v50 = vmax.f32 %v705_v48, 0.0  ;;  %v579_v51 = vpop.f32.mrb[11].mxu0  ;;  %v707_v52 = vpop.f32.mrb[11].mxu1 }
 0x129   :  { %882 = vst [vmem:[%s1652_s2 + $0x28] sm:$0xff] %v818_v49  ;;  %914 = vst [vmem:[%s1652_s2 + $0x128] sm:$0xff] %v850_v50 }
 0x12c   :  { %v582_v53 = vpop.f32.mrb[12].mxu0  ;;  %v710_v54 = vpop.f32.mrb[12].mxu1 }
 0x12d   :  { %v819_v55 = vmax.f32 %v582_v53, 0.0  ;;  %v851_v56 = vmax.f32 %v710_v54, 0.0  ;;  %v584_v57 = vpop.f32.mrb[13].mxu0  ;;  %v712_v58 = vpop.f32.mrb[13].mxu1 }
 0x12e   :  { %v585_v59 = vpop.f32.mrb[14].mxu0  ;;  %v713_v60 = vpop.f32.mrb[14].mxu1 }
 0x12f   :  { %883 = vst [vmem:[%s1652_s2 + $0x30] sm:$0xff] %v819_v55  ;;  %915 = vst [vmem:[%s1652_s2 + $0x130] sm:$0xff] %v851_v56  ;;  %v820_v61 = vmax.f32 %v585_v59, 0.0  ;;  %v852_v62 = vmax.f32 %v713_v60, 0.0  ;;  %v587_v63 = vpop.f32.mrb[15].mxu0  ;;  %v715_v0 = vpop.f32.mrb[15].mxu1 }
 0x131   :  { %884 = vst [vmem:[%s1652_s2 + $0x38] sm:$0xff] %v820_v61  ;;  %916 = vst [vmem:[%s1652_s2 + $0x138] sm:$0xff] %v852_v62 }
 0x134   :  { %v590_v1 = vpop.f32.mrb[16].mxu0  ;;  %v718_v2 = vpop.f32.mrb[16].mxu1 }
 0x135   :  { %v821_v3 = vmax.f32 %v590_v1, 0.0  ;;  %v853_v4 = vmax.f32 %v718_v2, 0.0  ;;  %v592_v5 = vpop.f32.mrb[17].mxu0  ;;  %v720_v6 = vpop.f32.mrb[17].mxu1 }
 0x136   :  { %v593_v7 = vpop.f32.mrb[18].mxu0  ;;  %v721_v8 = vpop.f32.mrb[18].mxu1 }
 0x137   :  { %885 = vst [vmem:[%s1652_s2 + $0x40] sm:$0xff] %v821_v3  ;;  %917 = vst [vmem:[%s1652_s2 + $0x140] sm:$0xff] %v853_v4  ;;  %v822_v9 = vmax.f32 %v593_v7, 0.0  ;;  %v854_v10 = vmax.f32 %v721_v8, 0.0  ;;  %v595_v11 = vpop.f32.mrb[19].mxu0  ;;  %v723_v12 = vpop.f32.mrb[19].mxu1 }
 0x139   :  { %886 = vst [vmem:[%s1652_s2 + $0x48] sm:$0xff] %v822_v9  ;;  %918 = vst [vmem:[%s1652_s2 + $0x148] sm:$0xff] %v854_v10 }
 0x13c   :  { %v598_v13 = vpop.f32.mrb[20].mxu0  ;;  %v726_v14 = vpop.f32.mrb[20].mxu1 }
 0x13d   :  { %v823_v15 = vmax.f32 %v598_v13, 0.0  ;;  %v855_v16 = vmax.f32 %v726_v14, 0.0  ;;  %v600_v17 = vpop.f32.mrb[21].mxu0  ;;  %v728_v18 = vpop.f32.mrb[21].mxu1 }
 0x13e   :  { %v601_v19 = vpop.f32.mrb[22].mxu0  ;;  %v729_v20 = vpop.f32.mrb[22].mxu1 }
 0x13f   :  { %887 = vst [vmem:[%s1652_s2 + $0x50] sm:$0xff] %v823_v15  ;;  %919 = vst [vmem:[%s1652_s2 + $0x150] sm:$0xff] %v855_v16  ;;  %v824_v21 = vmax.f32 %v601_v19, 0.0  ;;  %v856_v22 = vmax.f32 %v729_v20, 0.0  ;;  %v603_v23 = vpop.f32.mrb[23].mxu0  ;;  %v731_v24 = vpop.f32.mrb[23].mxu1 }
 0x141   :  { %888 = vst [vmem:[%s1652_s2 + $0x58] sm:$0xff] %v824_v21  ;;  %920 = vst [vmem:[%s1652_s2 + $0x158] sm:$0xff] %v856_v22 }
 0x144   :  { %v606_v25 = vpop.f32.mrb[24].mxu0  ;;  %v734_v26 = vpop.f32.mrb[24].mxu1 }
 0x145   :  { %v825_v27 = vmax.f32 %v606_v25, 0.0  ;;  %v857_v28 = vmax.f32 %v734_v26, 0.0  ;;  %v608_v29 = vpop.f32.mrb[25].mxu0  ;;  %v736_v30 = vpop.f32.mrb[25].mxu1 }
 0x146   :  { %v609_v31 = vpop.f32.mrb[26].mxu0  ;;  %v737_v32 = vpop.f32.mrb[26].mxu1 }
 0x147   :  { %889 = vst [vmem:[%s1652_s2 + $0x60] sm:$0xff] %v825_v27  ;;  %921 = vst [vmem:[%s1652_s2 + $0x160] sm:$0xff] %v857_v28  ;;  %v826_v33 = vmax.f32 %v609_v31, 0.0  ;;  %v858_v34 = vmax.f32 %v737_v32, 0.0  ;;  %v611_v35 = vpop.f32.mrb[27].mxu0  ;;  %v739_v36 = vpop.f32.mrb[27].mxu1 }
 0x149   :  { %890 = vst [vmem:[%s1652_s2 + $0x68] sm:$0xff] %v826_v33  ;;  %922 = vst [vmem:[%s1652_s2 + $0x168] sm:$0xff] %v858_v34 }
 0x14c   :  { %v614_v37 = vpop.f32.mrb[28].mxu0  ;;  %v742_v38 = vpop.f32.mrb[28].mxu1 }
 0x14d   :  { %v827_v39 = vmax.f32 %v614_v37, 0.0  ;;  %v859_v40 = vmax.f32 %v742_v38, 0.0  ;;  %v616_v41 = vpop.f32.mrb[29].mxu0  ;;  %v744_v42 = vpop.f32.mrb[29].mxu1 }
 0x14e   :  { %v617_v43 = vpop.f32.mrb[30].mxu0  ;;  %v745_v44 = vpop.f32.mrb[30].mxu1 }
 0x14f   :  { %891 = vst [vmem:[%s1652_s2 + $0x70] sm:$0xff] %v827_v39  ;;  %923 = vst [vmem:[%s1652_s2 + $0x170] sm:$0xff] %v859_v40  ;;  %v828_v45 = vmax.f32 %v617_v43, 0.0  ;;  %v860_v46 = vmax.f32 %v745_v44, 0.0  ;;  %v619_v47 = vpop.f32.mrb[31].mxu0  ;;  %v747_v48 = vpop.f32.mrb[31].mxu1 }
 0x151   :  { %892 = vst [vmem:[%s1652_s2 + $0x78] sm:$0xff] %v828_v45  ;;  %924 = vst [vmem:[%s1652_s2 + $0x178] sm:$0xff] %v860_v46 }
 0x154   :  { %v622_v49 = vpop.f32.mrb[32].mxu0  ;;  %v750_v50 = vpop.f32.mrb[32].mxu1 }
 0x155   :  { %v829_v51 = vmax.f32 %v622_v49, 0.0  ;;  %v861_v52 = vmax.f32 %v750_v50, 0.0  ;;  %v624_v53 = vpop.f32.mrb[33].mxu0  ;;  %v752_v54 = vpop.f32.mrb[33].mxu1 }
 0x156   :  { %v625_v55 = vpop.f32.mrb[34].mxu0  ;;  %v753_v56 = vpop.f32.mrb[34].mxu1 }
 0x157   :  { %893 = vst [vmem:[%s1652_s2 + $0x80] sm:$0xff] %v829_v51  ;;  %925 = vst [vmem:[%s1652_s2 + $0x180] sm:$0xff] %v861_v52  ;;  %v830_v57 = vmax.f32 %v625_v55, 0.0  ;;  %v862_v58 = vmax.f32 %v753_v56, 0.0  ;;  %v627_v59 = vpop.f32.mrb[35].mxu0  ;;  %v755_v60 = vpop.f32.mrb[35].mxu1 }
 0x159   :  { %894 = vst [vmem:[%s1652_s2 + $0x88] sm:$0xff] %v830_v57  ;;  %926 = vst [vmem:[%s1652_s2 + $0x188] sm:$0xff] %v862_v58 }
 0x15c   :  { %v630_v61 = vpop.f32.mrb[36].mxu0  ;;  %v758_v62 = vpop.f32.mrb[36].mxu1 }
 0x15d   :  { %v831_v63 = vmax.f32 %v630_v61, 0.0  ;;  %v863_v0 = vmax.f32 %v758_v62, 0.0  ;;  %v632_v1 = vpop.f32.mrb[37].mxu0  ;;  %v760_v2 = vpop.f32.mrb[37].mxu1 }
 0x15e   :  { %v633_v3 = vpop.f32.mrb[38].mxu0  ;;  %v761_v4 = vpop.f32.mrb[38].mxu1 }
 0x15f   :  { %895 = vst [vmem:[%s1652_s2 + $0x90] sm:$0xff] %v831_v63  ;;  %927 = vst [vmem:[%s1652_s2 + $0x190] sm:$0xff] %v863_v0  ;;  %v832_v5 = vmax.f32 %v633_v3, 0.0  ;;  %v864_v6 = vmax.f32 %v761_v4, 0.0  ;;  %v635_v7 = vpop.f32.mrb[39].mxu0  ;;  %v763_v8 = vpop.f32.mrb[39].mxu1 }
 0x161   :  { %896 = vst [vmem:[%s1652_s2 + $0x98] sm:$0xff] %v832_v5  ;;  %928 = vst [vmem:[%s1652_s2 + $0x198] sm:$0xff] %v864_v6 }
 0x164   :  { %v638_v9 = vpop.f32.mrb[40].mxu0  ;;  %v766_v10 = vpop.f32.mrb[40].mxu1 }
 0x165   :  { %v833_v11 = vmax.f32 %v638_v9, 0.0  ;;  %v865_v12 = vmax.f32 %v766_v10, 0.0  ;;  %v640_v13 = vpop.f32.mrb[41].mxu0  ;;  %v768_v14 = vpop.f32.mrb[41].mxu1 }
 0x166   :  { %v641_v15 = vpop.f32.mrb[42].mxu0  ;;  %v769_v16 = vpop.f32.mrb[42].mxu1 }
 0x167   :  { %897 = vst [vmem:[%s1652_s2 + $0xa0] sm:$0xff] %v833_v11  ;;  %929 = vst [vmem:[%s1652_s2 + $0x1a0] sm:$0xff] %v865_v12  ;;  %v834_v17 = vmax.f32 %v641_v15, 0.0  ;;  %v866_v18 = vmax.f32 %v769_v16, 0.0  ;;  %v643_v19 = vpop.f32.mrb[43].mxu0  ;;  %v771_v20 = vpop.f32.mrb[43].mxu1 }
 0x169   :  { %898 = vst [vmem:[%s1652_s2 + $0xa8] sm:$0xff] %v834_v17  ;;  %930 = vst [vmem:[%s1652_s2 + $0x1a8] sm:$0xff] %v866_v18 }
 0x16c   :  { %v646_v21 = vpop.f32.mrb[44].mxu0  ;;  %v774_v22 = vpop.f32.mrb[44].mxu1 }
 0x16d   :  { %v835_v23 = vmax.f32 %v646_v21, 0.0  ;;  %v867_v24 = vmax.f32 %v774_v22, 0.0  ;;  %v648_v25 = vpop.f32.mrb[45].mxu0  ;;  %v776_v26 = vpop.f32.mrb[45].mxu1 }
 0x16e   :  { %v649_v27 = vpop.f32.mrb[46].mxu0  ;;  %v777_v28 = vpop.f32.mrb[46].mxu1 }
 0x16f   :  { %899 = vst [vmem:[%s1652_s2 + $0xb0] sm:$0xff] %v835_v23  ;;  %931 = vst [vmem:[%s1652_s2 + $0x1b0] sm:$0xff] %v867_v24  ;;  %v836_v29 = vmax.f32 %v649_v27, 0.0  ;;  %v868_v30 = vmax.f32 %v777_v28, 0.0  ;;  %v651_v31 = vpop.f32.mrb[47].mxu0  ;;  %v779_v32 = vpop.f32.mrb[47].mxu1 }
 0x171   :  { %900 = vst [vmem:[%s1652_s2 + $0xb8] sm:$0xff] %v836_v29  ;;  %932 = vst [vmem:[%s1652_s2 + $0x1b8] sm:$0xff] %v868_v30 }
 0x174   :  { %v654_v33 = vpop.f32.mrb[48].mxu0  ;;  %v782_v34 = vpop.f32.mrb[48].mxu1 }
 0x175   :  { %v837_v35 = vmax.f32 %v654_v33, 0.0  ;;  %v869_v36 = vmax.f32 %v782_v34, 0.0  ;;  %v656_v37 = vpop.f32.mrb[49].mxu0  ;;  %v784_v38 = vpop.f32.mrb[49].mxu1 }
 0x176   :  { %v657_v39 = vpop.f32.mrb[50].mxu0  ;;  %v785_v40 = vpop.f32.mrb[50].mxu1 }
 0x177   :  { %901 = vst [vmem:[%s1652_s2 + $0xc0] sm:$0xff] %v837_v35  ;;  %933 = vst [vmem:[%s1652_s2 + $0x1c0] sm:$0xff] %v869_v36  ;;  %v838_v41 = vmax.f32 %v657_v39, 0.0  ;;  %v870_v42 = vmax.f32 %v785_v40, 0.0  ;;  %v659_v43 = vpop.f32.mrb[51].mxu0  ;;  %v787_v44 = vpop.f32.mrb[51].mxu1 }
 0x179   :  { %902 = vst [vmem:[%s1652_s2 + $0xc8] sm:$0xff] %v838_v41  ;;  %934 = vst [vmem:[%s1652_s2 + $0x1c8] sm:$0xff] %v870_v42 }
 0x17c   :  { %v662_v45 = vpop.f32.mrb[52].mxu0  ;;  %v790_v46 = vpop.f32.mrb[52].mxu1 }
 0x17d   :  { %v839_v47 = vmax.f32 %v662_v45, 0.0  ;;  %v871_v48 = vmax.f32 %v790_v46, 0.0  ;;  %v664_v49 = vpop.f32.mrb[53].mxu0  ;;  %v792_v50 = vpop.f32.mrb[53].mxu1 }
 0x17e   :  { %v665_v51 = vpop.f32.mrb[54].mxu0  ;;  %v793_v52 = vpop.f32.mrb[54].mxu1 }
 0x17f   :  { %903 = vst [vmem:[%s1652_s2 + $0xd0] sm:$0xff] %v839_v47  ;;  %935 = vst [vmem:[%s1652_s2 + $0x1d0] sm:$0xff] %v871_v48  ;;  %v840_v53 = vmax.f32 %v665_v51, 0.0  ;;  %v872_v54 = vmax.f32 %v793_v52, 0.0  ;;  %v667_v55 = vpop.f32.mrb[55].mxu0  ;;  %v795_v56 = vpop.f32.mrb[55].mxu1 }
 0x181   :  { %904 = vst [vmem:[%s1652_s2 + $0xd8] sm:$0xff] %v840_v53  ;;  %936 = vst [vmem:[%s1652_s2 + $0x1d8] sm:$0xff] %v872_v54 }
 0x184   :  { %v670_v57 = vpop.f32.mrb[56].mxu0  ;;  %v798_v58 = vpop.f32.mrb[56].mxu1 }
 0x185   :  { %v841_v59 = vmax.f32 %v670_v57, 0.0  ;;  %v873_v60 = vmax.f32 %v798_v58, 0.0  ;;  %v672_v61 = vpop.f32.mrb[57].mxu0  ;;  %v800_v62 = vpop.f32.mrb[57].mxu1 }
 0x186   :  { %v673_v63 = vpop.f32.mrb[58].mxu0  ;;  %v801_v0 = vpop.f32.mrb[58].mxu1 }
 0x187   :  { %905 = vst [vmem:[%s1652_s2 + $0xe0] sm:$0xff] %v841_v59  ;;  %937 = vst [vmem:[%s1652_s2 + $0x1e0] sm:$0xff] %v873_v60  ;;  %v842_v1 = vmax.f32 %v673_v63, 0.0  ;;  %v874_v2 = vmax.f32 %v801_v0, 0.0  ;;  %v675_v3 = vpop.f32.mrb[59].mxu0  ;;  %v803_v4 = vpop.f32.mrb[59].mxu1 }
 0x189   :  { %906 = vst [vmem:[%s1652_s2 + $0xe8] sm:$0xff] %v842_v1  ;;  %938 = vst [vmem:[%s1652_s2 + $0x1e8] sm:$0xff] %v874_v2 }
 0x18c   :  { %v678_v5 = vpop.f32.mrb[60].mxu0  ;;  %v806_v6 = vpop.f32.mrb[60].mxu1 }
 0x18d   :  { %v843_v7 = vmax.f32 %v678_v5, 0.0  ;;  %v875_v8 = vmax.f32 %v806_v6, 0.0  ;;  %v680_v9 = vpop.f32.mrb[61].mxu0  ;;  %v808_v10 = vpop.f32.mrb[61].mxu1 }
 0x18e   :  { %v681_v11 = vpop.f32.mrb[62].mxu0  ;;  %v809_v12 = vpop.f32.mrb[62].mxu1 }
 0x18f   :  { %907 = vst [vmem:[%s1652_s2 + $0xf0] sm:$0xff] %v843_v7  ;;  %939 = vst [vmem:[%s1652_s2 + $0x1f0] sm:$0xff] %v875_v8  ;;  %v844_v13 = vmax.f32 %v681_v11, 0.0  ;;  %v876_v14 = vmax.f32 %v809_v12, 0.0  ;;  %v683_v15 = vpop.f32.mrb[63].mxu0  ;;  %v811_v16 = vpop.f32.mrb[63].mxu1 }
 0x191   :  { %908 = vst [vmem:[%s1652_s2 + $0xf8] sm:$0xff] %v844_v13  ;;  %940 = vst [vmem:[%s1652_s2 + $0x1f8] sm:$0xff] %v876_v14 }

// kernel: encoder_forward.7
= control target key start
LH: loop header
LB: loop body
LE: loop exit
PB: predicated region body
PF: predicated region fallthrough
CT: control target
= control target key end

     0   :  { %s1217_s1 = inlined_call_operand.vmem [shape: bf16[512,128], index: 1, kind: input, shape index: {}]   ;;  %s1218_s0 = inlined_call_operand.vmem [shape: bf16[128,512], index: 0, kind: input, shape index: {}]   ;;  %s1219_s2 = inlined_call_operand.vmem [shape: f32[128,128], index: 2, kind: output, shape index: {}]  }
   0x1   :  { %v882_v0 = vld [vmem:[%s1217_s1 + $0x40] sm:$0xff]   ;;  %v886_v4 = vld [vmem:[%s1217_s1 + $0x48] sm:$0xff]   ;;  %v890_v8 = vld [vmem:[%s1217_s1 + $0x50] sm:$0xff]  }
   0x2   :  { %v883_v1 = vld [vmem:[%s1217_s1 + $0xc0] sm:$0xff]   ;;  %754 = vmatprep.subr.bf16.mxu0 %v882_v0  ;;  %v887_v5 = vld [vmem:[%s1217_s1 + $0xc8] sm:$0xff]   ;;  %v891_v9 = vld [vmem:[%s1217_s1 + $0xd0] sm:$0xff]  }
   0x3   :  { %v884_v2 = vld [vmem:[%s1217_s1] sm:$0xff]   ;;  %818 = vmatprep.subr.bf16.mxu1 %v883_v1  ;;  %v888_v6 = vld [vmem:[%s1217_s1 + $0x8] sm:$0xff]   ;;  %v892_v10 = vld [vmem:[%s1217_s1 + $0x10] sm:$0xff]  }
   0x4   :  { %v885_v3 = vld [vmem:[%s1217_s1 + $0x80] sm:$0xff]   ;;  %755 = vmatpush3.bf16.msra.mxu0 %v884_v2  ;;  %v889_v7 = vld [vmem:[%s1217_s1 + $0x88] sm:$0xff]   ;;  %v893_v11 = vld [vmem:[%s1217_s1 + $0x90] sm:$0xff]  }
   0x5   :  { %819 = vmatpush3.bf16.msra.mxu1 %v885_v3  ;;  %756 = vmatprep.subr.bf16.mxu0 %v886_v4  ;;  %v894_v12 = vld [vmem:[%s1217_s1 + $0x58] sm:$0xff]   ;;  %v898_v16 = vld [vmem:[%s1217_s1 + $0x60] sm:$0xff]   ;;  %v902_v20 = vld [vmem:[%s1217_s1 + $0x68] sm:$0xff]  }
   0x6   :  { %820 = vmatprep.subr.bf16.mxu1 %v887_v5  ;;  %v895_v13 = vld [vmem:[%s1217_s1 + $0xd8] sm:$0xff]   ;;  %v899_v17 = vld [vmem:[%s1217_s1 + $0xe0] sm:$0xff]   ;;  %v903_v21 = vld [vmem:[%s1217_s1 + $0xe8] sm:$0xff]  }
   0x7   :  { %v896_v14 = vld [vmem:[%s1217_s1 + $0x18] sm:$0xff]   ;;  %v900_v18 = vld [vmem:[%s1217_s1 + $0x20] sm:$0xff]   ;;  %v904_v22 = vld [vmem:[%s1217_s1 + $0x28] sm:$0xff]  }
   0x8   :  { %757 = vmatpush3.bf16.msra.mxu0 %v888_v6  ;;  %v897_v15 = vld [vmem:[%s1217_s1 + $0x98] sm:$0xff]   ;;  %v901_v19 = vld [vmem:[%s1217_s1 + $0xa0] sm:$0xff]   ;;  %v905_v23 = vld [vmem:[%s1217_s1 + $0xa8] sm:$0xff]  }
   0x9   :  { %821 = vmatpush3.bf16.msra.mxu1 %v889_v7  ;;  %758 = vmatprep.subr.bf16.mxu0 %v890_v8  ;;  %v906_v24 = vld [vmem:[%s1217_s1 + $0x70] sm:$0xff]   ;;  %v910_v28 = vld [vmem:[%s1217_s1 + $0x78] sm:$0xff]  }
   0xa   :  { %822 = vmatprep.subr.bf16.mxu1 %v891_v9  ;;  %v907_v25 = vld [vmem:[%s1217_s1 + $0xf0] sm:$0xff]   ;;  %v911_v29 = vld [vmem:[%s1217_s1 + $0xf8] sm:$0xff]  }
   0xb   :  { %v908_v26 = vld [vmem:[%s1217_s1 + $0x30] sm:$0xff]   ;;  %v912_v30 = vld [vmem:[%s1217_s1 + $0x38] sm:$0xff]  }
   0xc   :  { %759 = vmatpush3.bf16.msra.mxu0 %v892_v10  ;;  %v909_v27 = vld [vmem:[%s1217_s1 + $0xb0] sm:$0xff]   ;;  %v913_v31 = vld [vmem:[%s1217_s1 + $0xb8] sm:$0xff]  }
   0xd   :  { %823 = vmatpush3.bf16.msra.mxu1 %v893_v11  ;;  %760 = vmatprep.subr.bf16.mxu0 %v894_v12  ;;  %v914_v32 = vld [vmem:[%s1218_s0] ss:$16 sps:$4 sm:$0xff]   ;;  %v916_v33 = vld [vmem:[%s1218_s0 + $0x4] ss:$16 sps:$4 sm:$0xff]   ;;  %v917_v34 = vld [vmem:[%s1218_s0 + $0x8] ss:$16 sps:$4 sm:$0xff]  }
   0xe   :  { %824 = vmatprep.subr.bf16.mxu1 %v895_v13  ;;  %v919_v35 = vld [vmem:[%s1218_s0 + $0xc] ss:$16 sps:$4 sm:$0xff]   ;;  %492 = vmatprep.mubr.bf16.mxu0 %v916_v33  ;;  %v920_v36 = vld [vmem:[%s1218_s0 + $0x24] ss:$16 sps:$4 sm:$0xff]   ;;  %v924_v38 = vld [vmem:[%s1218_s0 + $0x20] ss:$16 sps:$4 sm:$0xff]  }
   0xf   :  { %589 = vmatprep.mubr.bf16.mxu1 %v919_v35  ;;  %v922_v37 = vld [vmem:[%s1218_s0 + $0x2c] ss:$16 sps:$4 sm:$0xff]   ;;  %v925_v39 = vld [vmem:[%s1218_s0 + $0x28] ss:$16 sps:$4 sm:$0xff]   ;;  %v926_v40 = vld [vmem:[%s1218_s0 + $0x44] ss:$16 sps:$4 sm:$0xff]  }
  0x10   :  { %761 = vmatpush3.bf16.msra.mxu0 %v896_v14  ;;  %v928_v41 = vld [vmem:[%s1218_s0 + $0x4c] ss:$16 sps:$4 sm:$0xff]   ;;  %v930_v42 = vld [vmem:[%s1218_s0 + $0x40] ss:$16 sps:$4 sm:$0xff]   ;;  %v931_v43 = vld [vmem:[%s1218_s0 + $0x48] ss:$16 sps:$4 sm:$0xff]  }
  0x11   :  { %825 = vmatpush3.bf16.msra.mxu1 %v897_v15  ;;  %762 = vmatprep.subr.bf16.mxu0 %v898_v16  ;;  %v932_v44 = vld [vmem:[%s1218_s0 + $0x64] ss:$16 sps:$4 sm:$0xff]   ;;  %v934_v45 = vld [vmem:[%s1218_s0 + $0x6c] ss:$16 sps:$4 sm:$0xff]   ;;  %v936_v46 = vld [vmem:[%s1218_s0 + $0x60] ss:$16 sps:$4 sm:$0xff]  }
  0x12   :  { %826 = vmatprep.subr.bf16.mxu1 %v899_v17  ;;  %v937_v47 = vld [vmem:[%s1218_s0 + $0x68] ss:$16 sps:$4 sm:$0xff]   ;;  %v938_v48 = vld [vmem:[%s1218_s0 + $0x84] ss:$16 sps:$4 sm:$0xff]   ;;  %v940_v49 = vld [vmem:[%s1218_s0 + $0x8c] ss:$16 sps:$4 sm:$0xff]  }
  0x13   :  { %v942_v50 = vld [vmem:[%s1218_s0 + $0x80] ss:$16 sps:$4 sm:$0xff]   ;;  %v943_v51 = vld [vmem:[%s1218_s0 + $0x88] ss:$16 sps:$4 sm:$0xff]   ;;  %v944_v52 = vld [vmem:[%s1218_s0 + $0xa4] ss:$16 sps:$4 sm:$0xff]  }
  0x14   :  { %763 = vmatpush3.bf16.msra.mxu0 %v900_v18  ;;  %v946_v53 = vld [vmem:[%s1218_s0 + $0xac] ss:$16 sps:$4 sm:$0xff]   ;;  %v948_v54 = vld [vmem:[%s1218_s0 + $0xa0] ss:$16 sps:$4 sm:$0xff]   ;;  %v949_v55 = vld [vmem:[%s1218_s0 + $0xa8] ss:$16 sps:$4 sm:$0xff]  }
  0x15   :  { %827 = vmatpush3.bf16.msra.mxu1 %v901_v19  ;;  %764 = vmatprep.subr.bf16.mxu0 %v902_v20  ;;  %v950_v56 = vld [vmem:[%s1218_s0 + $0xc4] ss:$16 sps:$4 sm:$0xff]   ;;  %v952_v57 = vld [vmem:[%s1218_s0 + $0xcc] ss:$16 sps:$4 sm:$0xff]   ;;  %v954_v58 = vld [vmem:[%s1218_s0 + $0xc0] ss:$16 sps:$4 sm:$0xff]  }
  0x16   :  { %828 = vmatprep.subr.bf16.mxu1 %v903_v21  ;;  %v955_v59 = vld [vmem:[%s1218_s0 + $0xc8] ss:$16 sps:$4 sm:$0xff]   ;;  %v956_v60 = vld [vmem:[%s1218_s0 + $0xe4] ss:$16 sps:$4 sm:$0xff]   ;;  %v958_v61 = vld [vmem:[%s1218_s0 + $0xec] ss:$16 sps:$4 sm:$0xff]  }
  0x17   :  { %v960_v62 = vld [vmem:[%s1218_s0 + $0xe0] ss:$16 sps:$4 sm:$0xff]   ;;  %v961_v63 = vld [vmem:[%s1218_s0 + $0xe8] ss:$16 sps:$4 sm:$0xff]  }
  0x18   :  { %765 = vmatpush3.bf16.msra.mxu0 %v904_v22 }
  0x19   :  { %829 = vmatpush3.bf16.msra.mxu1 %v905_v23  ;;  %766 = vmatprep.subr.bf16.mxu0 %v906_v24 }
  0x1a   :  { %830 = vmatprep.subr.bf16.mxu1 %v907_v25 }
  0x1c   :  { %767 = vmatpush3.bf16.msra.mxu0 %v908_v26 }
  0x1d   :  { %831 = vmatpush3.bf16.msra.mxu1 %v909_v27  ;;  %768 = vmatprep.subr.bf16.mxu0 %v910_v28 }
  0x1e   :  { %832 = vmatprep.subr.bf16.mxu1 %v911_v29 }
  0x20   :  { %769 = vmatpush3.bf16.msra.mxu0 %v912_v30 }
  0x21   :  { %833 = vmatpush3.bf16.msra.mxu1 %v913_v31 }
  0x23   :  { %493 = vmatmul.mubr.bf16.vlgmr.msra.gmra.mrb[0].mxu0 %v914_v32 }
  0x24   :  { %590 = vmatmul.mubr.bf16.vlgmr.msra.gmra.mrb[0].mxu1 %v917_v34  ;;  %500 = vmatprep.mubr.bf16.mxu0 %v920_v36 }
  0x25   :  { %597 = vmatprep.mubr.bf16.mxu1 %v922_v37 }
  0x2b   :  { %501 = vmatmul.mubr.bf16.gmra.mrb[4].mxu0 %v924_v38 }
  0x2c   :  { %598 = vmatmul.mubr.bf16.gmra.mrb[4].mxu1 %v925_v39  ;;  %508 = vmatprep.mubr.bf16.mxu0 %v926_v40 }
  0x2d   :  { %605 = vmatprep.mubr.bf16.mxu1 %v928_v41 }
  0x33   :  { %509 = vmatmul.mubr.bf16.gmra.mrb[8].mxu0 %v930_v42 }
  0x34   :  { %606 = vmatmul.mubr.bf16.gmra.mrb[8].mxu1 %v931_v43  ;;  %516 = vmatprep.mubr.bf16.mxu0 %v932_v44 }
  0x35   :  { %613 = vmatprep.mubr.bf16.mxu1 %v934_v45 }
  0x3b   :  { %517 = vmatmul.mubr.bf16.gmra.mrb[12].mxu0 %v936_v46 }
  0x3c   :  { %614 = vmatmul.mubr.bf16.gmra.mrb[12].mxu1 %v937_v47  ;;  %524 = vmatprep.mubr.bf16.mxu0 %v938_v48 }
  0x3d   :  { %621 = vmatprep.mubr.bf16.mxu1 %v940_v49 }
  0x43   :  { %525 = vmatmul.mubr.bf16.gmra.mrb[16].mxu0 %v942_v50 }
  0x44   :  { %622 = vmatmul.mubr.bf16.gmra.mrb[16].mxu1 %v943_v51  ;;  %532 = vmatprep.mubr.bf16.mxu0 %v944_v52 }
  0x45   :  { %629 = vmatprep.mubr.bf16.mxu1 %v946_v53 }
  0x4b   :  { %533 = vmatmul.mubr.bf16.gmra.mrb[20].mxu0 %v948_v54 }
  0x4c   :  { %630 = vmatmul.mubr.bf16.gmra.mrb[20].mxu1 %v949_v55  ;;  %540 = vmatprep.mubr.bf16.mxu0 %v950_v56 }
  0x4d   :  { %637 = vmatprep.mubr.bf16.mxu1 %v952_v57 }
  0x53   :  { %541 = vmatmul.mubr.bf16.gmra.mrb[24].mxu0 %v954_v58 }
  0x54   :  { %638 = vmatmul.mubr.bf16.gmra.mrb[24].mxu1 %v955_v59  ;;  %548 = vmatprep.mubr.bf16.mxu0 %v956_v60 }
  0x55   :  { %645 = vmatprep.mubr.bf16.mxu1 %v958_v61 }
  0x5b   :  { %549 = vmatmul.mubr.bf16.gmra.mrb[28].mxu0 %v960_v62 }
  0x5c   :  { %646 = vmatmul.mubr.bf16.gmra.mrb[28].mxu1 %v961_v63 }
  0xf6   :  { %v770_v0 = vpop.f32.mrb[0].mxu0 }
  0xf7   :  { %v834_v1 = vpop.f32.mrb[0].mxu1  ;;  %v771_v2 = vpop.f32.mrb[1].mxu0 }
  0xf8   :  { %v772_v3 = vadd.f32 %v771_v2, %v770_v0  ;;  %v835_v4 = vpop.f32.mrb[1].mxu1  ;;  %v773_v5 = vpop.f32.mrb[2].mxu0 }
  0xf9   :  { %v836_v6 = vadd.f32 %v835_v4, %v834_v1  ;;  %v837_v7 = vpop.f32.mrb[2].mxu1  ;;  %v774_v8 = vpop.f32.mrb[3].mxu0 }
  0xfa   :  { %v775_v9 = vadd.f32 %v774_v8, %v773_v5  ;;  %v838_v10 = vpop.f32.mrb[3].mxu1 }
  0xfb   :  { %v592_v11 = vadd.f32 %v836_v6, %v772_v3  ;;  %v839_v12 = vadd.f32 %v838_v10, %v837_v7 }
  0xfd   :  { %v654_v13 = vmax.f32 %v592_v11, 0.0  ;;  %v595_v14 = vadd.f32 %v839_v12, %v775_v9 }
  0xfe   :  { %v776_v15 = vpop.f32.mrb[4].mxu0 }
  0xff   :  { %670 = vst [vmem:[%s1219_s2] sm:$0xff] %v654_v13  ;;  %v655_v16 = vmax.f32 %v595_v14, 0.0  ;;  %v840_v17 = vpop.f32.mrb[4].mxu1  ;;  %v777_v18 = vpop.f32.mrb[5].mxu0 }
 0x100   :  { %v778_v19 = vadd.f32 %v777_v18, %v776_v15  ;;  %v841_v20 = vpop.f32.mrb[5].mxu1  ;;  %v779_v21 = vpop.f32.mrb[6].mxu0 }
 0x101   :  { %671 = vst [vmem:[%s1219_s2 + $0x8] sm:$0xff] %v655_v16  ;;  %v842_v22 = vadd.f32 %v841_v20, %v840_v17  ;;  %v843_v23 = vpop.f32.mrb[6].mxu1  ;;  %v780_v24 = vpop.f32.mrb[7].mxu0 }
 0x102   :  { %v781_v25 = vadd.f32 %v780_v24, %v779_v21  ;;  %v844_v26 = vpop.f32.mrb[7].mxu1 }
 0x103   :  { %v600_v27 = vadd.f32 %v842_v22, %v778_v19  ;;  %v845_v28 = vadd.f32 %v844_v26, %v843_v23 }
 0x105   :  { %v656_v29 = vmax.f32 %v600_v27, 0.0  ;;  %v603_v30 = vadd.f32 %v845_v28, %v781_v25 }
 0x106   :  { %v782_v31 = vpop.f32.mrb[8].mxu0 }
 0x107   :  { %672 = vst [vmem:[%s1219_s2 + $0x10] sm:$0xff] %v656_v29  ;;  %v657_v32 = vmax.f32 %v603_v30, 0.0  ;;  %v846_v33 = vpop.f32.mrb[8].mxu1  ;;  %v783_v34 = vpop.f32.mrb[9].mxu0 }
 0x108   :  { %v784_v35 = vadd.f32 %v783_v34, %v782_v31  ;;  %v847_v36 = vpop.f32.mrb[9].mxu1  ;;  %v785_v37 = vpop.f32.mrb[10].mxu0 }
 0x109   :  { %673 = vst [vmem:[%s1219_s2 + $0x18] sm:$0xff] %v657_v32  ;;  %v848_v38 = vadd.f32 %v847_v36, %v846_v33  ;;  %v849_v39 = vpop.f32.mrb[10].mxu1  ;;  %v786_v40 = vpop.f32.mrb[11].mxu0 }
 0x10a   :  { %v787_v41 = vadd.f32 %v786_v40, %v785_v37  ;;  %v850_v42 = vpop.f32.mrb[11].mxu1 }
 0x10b   :  { %v608_v43 = vadd.f32 %v848_v38, %v784_v35  ;;  %v851_v44 = vadd.f32 %v850_v42, %v849_v39 }
 0x10d   :  { %v658_v45 = vmax.f32 %v608_v43, 0.0  ;;  %v611_v46 = vadd.f32 %v851_v44, %v787_v41 }
 0x10e   :  { %v788_v47 = vpop.f32.mrb[12].mxu0 }
 0x10f   :  { %674 = vst [vmem:[%s1219_s2 + $0x20] sm:$0xff] %v658_v45  ;;  %v659_v48 = vmax.f32 %v611_v46, 0.0  ;;  %v852_v49 = vpop.f32.mrb[12].mxu1  ;;  %v789_v50 = vpop.f32.mrb[13].mxu0 }
 0x110   :  { %v790_v51 = vadd.f32 %v789_v50, %v788_v47  ;;  %v853_v52 = vpop.f32.mrb[13].mxu1  ;;  %v791_v53 = vpop.f32.mrb[14].mxu0 }
 0x111   :  { %675 = vst [vmem:[%s1219_s2 + $0x28] sm:$0xff] %v659_v48  ;;  %v854_v54 = vadd.f32 %v853_v52, %v852_v49  ;;  %v855_v55 = vpop.f32.mrb[14].mxu1  ;;  %v792_v56 = vpop.f32.mrb[15].mxu0 }
 0x112   :  { %v793_v57 = vadd.f32 %v792_v56, %v791_v53  ;;  %v856_v58 = vpop.f32.mrb[15].mxu1 }
 0x113   :  { %v616_v59 = vadd.f32 %v854_v54, %v790_v51  ;;  %v857_v60 = vadd.f32 %v856_v58, %v855_v55 }
 0x115   :  { %v660_v61 = vmax.f32 %v616_v59, 0.0  ;;  %v619_v62 = vadd.f32 %v857_v60, %v793_v57 }
 0x116   :  { %v794_v63 = vpop.f32.mrb[16].mxu0 }
 0x117   :  { %676 = vst [vmem:[%s1219_s2 + $0x30] sm:$0xff] %v660_v61  ;;  %v661_v0 = vmax.f32 %v619_v62, 0.0  ;;  %v858_v1 = vpop.f32.mrb[16].mxu1  ;;  %v795_v2 = vpop.f32.mrb[17].mxu0 }
 0x118   :  { %v796_v3 = vadd.f32 %v795_v2, %v794_v63  ;;  %v859_v4 = vpop.f32.mrb[17].mxu1  ;;  %v797_v5 = vpop.f32.mrb[18].mxu0 }
 0x119   :  { %677 = vst [vmem:[%s1219_s2 + $0x38] sm:$0xff] %v661_v0  ;;  %v860_v6 = vadd.f32 %v859_v4, %v858_v1  ;;  %v861_v7 = vpop.f32.mrb[18].mxu1  ;;  %v798_v8 = vpop.f32.mrb[19].mxu0 }
 0x11a   :  { %v799_v9 = vadd.f32 %v798_v8, %v797_v5  ;;  %v862_v10 = vpop.f32.mrb[19].mxu1 }
 0x11b   :  { %v624_v11 = vadd.f32 %v860_v6, %v796_v3  ;;  %v863_v12 = vadd.f32 %v862_v10, %v861_v7 }
 0x11d   :  { %v662_v13 = vmax.f32 %v624_v11, 0.0  ;;  %v627_v14 = vadd.f32 %v863_v12, %v799_v9 }
 0x11e   :  { %v800_v15 = vpop.f32.mrb[20].mxu0 }
 0x11f   :  { %678 = vst [vmem:[%s1219_s2 + $0x40] sm:$0xff] %v662_v13  ;;  %v663_v16 = vmax.f32 %v627_v14, 0.0  ;;  %v864_v17 = vpop.f32.mrb[20].mxu1  ;;  %v801_v18 = vpop.f32.mrb[21].mxu0 }
 0x120   :  { %v802_v19 = vadd.f32 %v801_v18, %v800_v15  ;;  %v865_v20 = vpop.f32.mrb[21].mxu1  ;;  %v803_v21 = vpop.f32.mrb[22].mxu0 }
 0x121   :  { %679 = vst [vmem:[%s1219_s2 + $0x48] sm:$0xff] %v663_v16  ;;  %v866_v22 = vadd.f32 %v865_v20, %v864_v17  ;;  %v867_v23 = vpop.f32.mrb[22].mxu1  ;;  %v804_v24 = vpop.f32.mrb[23].mxu0 }
 0x122   :  { %v805_v25 = vadd.f32 %v804_v24, %v803_v21  ;;  %v868_v26 = vpop.f32.mrb[23].mxu1 }
 0x123   :  { %v632_v27 = vadd.f32 %v866_v22, %v802_v19  ;;  %v869_v28 = vadd.f32 %v868_v26, %v867_v23 }
 0x125   :  { %v664_v29 = vmax.f32 %v632_v27, 0.0  ;;  %v635_v30 = vadd.f32 %v869_v28, %v805_v25 }
 0x126   :  { %v806_v31 = vpop.f32.mrb[24].mxu0 }
 0x127   :  { %680 = vst [vmem:[%s1219_s2 + $0x50] sm:$0xff] %v664_v29  ;;  %v665_v32 = vmax.f32 %v635_v30, 0.0  ;;  %v870_v33 = vpop.f32.mrb[24].mxu1  ;;  %v807_v34 = vpop.f32.mrb[25].mxu0 }
 0x128   :  { %v808_v35 = vadd.f32 %v807_v34, %v806_v31  ;;  %v871_v36 = vpop.f32.mrb[25].mxu1  ;;  %v809_v37 = vpop.f32.mrb[26].mxu0 }
 0x129   :  { %681 = vst [vmem:[%s1219_s2 + $0x58] sm:$0xff] %v665_v32  ;;  %v872_v38 = vadd.f32 %v871_v36, %v870_v33  ;;  %v873_v39 = vpop.f32.mrb[26].mxu1  ;;  %v810_v40 = vpop.f32.mrb[27].mxu0 }
 0x12a   :  { %v811_v41 = vadd.f32 %v810_v40, %v809_v37  ;;  %v874_v42 = vpop.f32.mrb[27].mxu1 }
 0x12b   :  { %v640_v43 = vadd.f32 %v872_v38, %v808_v35  ;;  %v875_v44 = vadd.f32 %v874_v42, %v873_v39 }
 0x12d   :  { %v666_v45 = vmax.f32 %v640_v43, 0.0  ;;  %v643_v46 = vadd.f32 %v875_v44, %v811_v41 }
 0x12e   :  { %v812_v47 = vpop.f32.mrb[28].mxu0 }
 0x12f   :  { %682 = vst [vmem:[%s1219_s2 + $0x60] sm:$0xff] %v666_v45  ;;  %v667_v48 = vmax.f32 %v643_v46, 0.0  ;;  %v876_v49 = vpop.f32.mrb[28].mxu1  ;;  %v813_v50 = vpop.f32.mrb[29].mxu0 }
 0x130   :  { %v814_v51 = vadd.f32 %v813_v50, %v812_v47  ;;  %v877_v52 = vpop.f32.mrb[29].mxu1  ;;  %v815_v53 = vpop.f32.mrb[30].mxu0 }
 0x131   :  { %683 = vst [vmem:[%s1219_s2 + $0x68] sm:$0xff] %v667_v48  ;;  %v878_v54 = vadd.f32 %v877_v52, %v876_v49  ;;  %v879_v55 = vpop.f32.mrb[30].mxu1  ;;  %v816_v56 = vpop.f32.mrb[31].mxu0 }
 0x132   :  { %v817_v57 = vadd.f32 %v816_v56, %v815_v53  ;;  %v880_v58 = vpop.f32.mrb[31].mxu1 }
 0x133   :  { %v648_v59 = vadd.f32 %v878_v54, %v814_v51  ;;  %v881_v60 = vadd.f32 %v880_v58, %v879_v55 }
 0x135   :  { %v668_v61 = vmax.f32 %v648_v59, 0.0  ;;  %v651_v62 = vadd.f32 %v881_v60, %v817_v57 }
 0x137   :  { %684 = vst [vmem:[%s1219_s2 + $0x70] sm:$0xff] %v668_v61  ;;  %v669_v63 = vmax.f32 %v651_v62, 0.0 }
 0x139   :  { %685 = vst [vmem:[%s1219_s2 + $0x78] sm:$0xff] %v669_v63 }

// kernel: encoder_forward.8
= control target key start
LH: loop header
LB: loop body
LE: loop exit
PB: predicated region body
PF: predicated region fallthrough
CT: control target
= control target key end

     0   :  { %s1351_s1 = inlined_call_operand.vmem [shape: bf16[1024,128], index: 1, kind: input, shape index: {}]   ;;  %s1352_s0 = inlined_call_operand.vmem [shape: bf16[32,1024], index: 0, kind: input, shape index: {}]   ;;  %s1353_s2 = inlined_call_operand.vmem [shape: f32[32,128], index: 2, kind: output, shape index: {}]  }
   0x1   :  { %v1020_v0 = vld [vmem:[%s1351_s1 + $0x40] sm:$0xff]   ;;  %v1024_v4 = vld [vmem:[%s1351_s1 + $0x48] sm:$0xff]   ;;  %v1028_v8 = vld [vmem:[%s1351_s1 + $0x50] sm:$0xff]  }
   0x2   :  { %v1021_v1 = vld [vmem:[%s1351_s1 + $0xc0] sm:$0xff]   ;;  %908 = vmatprep.subr.bf16.mxu0 %v1020_v0  ;;  %v1025_v5 = vld [vmem:[%s1351_s1 + $0xc8] sm:$0xff]   ;;  %v1029_v9 = vld [vmem:[%s1351_s1 + $0xd0] sm:$0xff]  }
   0x3   :  { %v1022_v2 = vld [vmem:[%s1351_s1] sm:$0xff]   ;;  %936 = vmatprep.subr.bf16.mxu1 %v1021_v1  ;;  %v1026_v6 = vld [vmem:[%s1351_s1 + $0x8] sm:$0xff]   ;;  %v1030_v10 = vld [vmem:[%s1351_s1 + $0x10] sm:$0xff]  }
   0x4   :  { %v1023_v3 = vld [vmem:[%s1351_s1 + $0x80] sm:$0xff]   ;;  %909 = vmatpush3.bf16.msra.mxu0 %v1022_v2  ;;  %v1027_v7 = vld [vmem:[%s1351_s1 + $0x88] sm:$0xff]   ;;  %v1031_v11 = vld [vmem:[%s1351_s1 + $0x90] sm:$0xff]  }
   0x5   :  { %937 = vmatpush3.bf16.msra.mxu1 %v1023_v3  ;;  %910 = vmatprep.subr.bf16.mxu0 %v1024_v4  ;;  %v1032_v12 = vld [vmem:[%s1351_s1 + $0x58] sm:$0xff]   ;;  %v1036_v16 = vld [vmem:[%s1351_s1 + $0x60] sm:$0xff]   ;;  %v1040_v20 = vld [vmem:[%s1351_s1 + $0x68] sm:$0xff]  }
   0x6   :  { %938 = vmatprep.subr.bf16.mxu1 %v1025_v5  ;;  %v1033_v13 = vld [vmem:[%s1351_s1 + $0xd8] sm:$0xff]   ;;  %v1037_v17 = vld [vmem:[%s1351_s1 + $0xe0] sm:$0xff]   ;;  %v1041_v21 = vld [vmem:[%s1351_s1 + $0xe8] sm:$0xff]  }
   0x7   :  { %v1034_v14 = vld [vmem:[%s1351_s1 + $0x18] sm:$0xff]   ;;  %v1038_v18 = vld [vmem:[%s1351_s1 + $0x20] sm:$0xff]   ;;  %v1042_v22 = vld [vmem:[%s1351_s1 + $0x28] sm:$0xff]  }
   0x8   :  { %911 = vmatpush3.bf16.msra.mxu0 %v1026_v6  ;;  %v1035_v15 = vld [vmem:[%s1351_s1 + $0x98] sm:$0xff]   ;;  %v1039_v19 = vld [vmem:[%s1351_s1 + $0xa0] sm:$0xff]   ;;  %v1043_v23 = vld [vmem:[%s1351_s1 + $0xa8] sm:$0xff]  }
   0x9   :  { %939 = vmatpush3.bf16.msra.mxu1 %v1027_v7  ;;  %912 = vmatprep.subr.bf16.mxu0 %v1028_v8  ;;  %v1044_v24 = vld [vmem:[%s1351_s1 + $0x70] sm:$0xff]   ;;  %v1048_v28 = vld [vmem:[%s1351_s1 + $0x78] sm:$0xff]   ;;  %v12_v32 = vld [vmem:[%s1352_s0] sm:$0xff] }
   0xa   :  { %940 = vmatprep.subr.bf16.mxu1 %v1029_v9  ;;  %v1045_v25 = vld [vmem:[%s1351_s1 + $0xf0] sm:$0xff]   ;;  %v1049_v29 = vld [vmem:[%s1351_s1 + $0xf8] sm:$0xff]   ;;  %v16_v33 = vld [vmem:[%s1352_s0 + $0x20] sm:$0xff] }
   0xb   :  { %v1046_v26 = vld [vmem:[%s1351_s1 + $0x30] sm:$0xff]   ;;  %v1050_v30 = vld [vmem:[%s1351_s1 + $0x38] sm:$0xff]   ;;  %v13_v34 = vld [vmem:[%s1352_s0 + $0x8] sm:$0xff]  ;;  %v828_v35 = vcombine.low %v12_v32, %v16_v33  ;;  %v829_v36 = vcombine.high %v12_v32, %v16_v33 }
   0xc   :  { %913 = vmatpush3.bf16.msra.mxu0 %v1030_v10  ;;  %v1047_v27 = vld [vmem:[%s1351_s1 + $0xb0] sm:$0xff]   ;;  %v1051_v31 = vld [vmem:[%s1351_s1 + $0xb8] sm:$0xff]   ;;  %v17_v37 = vld [vmem:[%s1352_s0 + $0x28] sm:$0xff] }
   0xd   :  { %941 = vmatpush3.bf16.msra.mxu1 %v1031_v11  ;;  %914 = vmatprep.subr.bf16.mxu0 %v1032_v12  ;;  %v830_v38 = vcombine.low %v13_v34, %v17_v37  ;;  %v831_v39 = vcombine.high %v13_v34, %v17_v37  ;;  %v1052_v40 = vld [vmem:[%s1351_s1 + $0x140] sm:$0xff]   ;;  %v1056_v44 = vld [vmem:[%s1351_s1 + $0x148] sm:$0xff]   ;;  %v1060_v48 = vld [vmem:[%s1351_s1 + $0x150] sm:$0xff]  }
   0xe   :  { %942 = vmatprep.subr.bf16.mxu1 %v1033_v13  ;;  %652 = vmatprep.mubr.bf16.mxu0 %v829_v36  ;;  %v1053_v41 = vld [vmem:[%s1351_s1 + $0x1c0] sm:$0xff]   ;;  %v1057_v45 = vld [vmem:[%s1351_s1 + $0x1c8] sm:$0xff]   ;;  %v1061_v49 = vld [vmem:[%s1351_s1 + $0x1d0] sm:$0xff]  }
   0xf   :  { %701 = vmatprep.mubr.bf16.mxu1 %v831_v39  ;;  %v1054_v42 = vld [vmem:[%s1351_s1 + $0x100] sm:$0xff]   ;;  %v1058_v46 = vld [vmem:[%s1351_s1 + $0x108] sm:$0xff]   ;;  %v1062_v50 = vld [vmem:[%s1351_s1 + $0x110] sm:$0xff]  }
  0x10   :  { %915 = vmatpush3.bf16.msra.mxu0 %v1034_v14  ;;  %v1055_v43 = vld [vmem:[%s1351_s1 + $0x180] sm:$0xff]   ;;  %v1059_v47 = vld [vmem:[%s1351_s1 + $0x188] sm:$0xff]   ;;  %v1063_v51 = vld [vmem:[%s1351_s1 + $0x190] sm:$0xff]  }
  0x11   :  { %943 = vmatpush3.bf16.msra.mxu1 %v1035_v15  ;;  %916 = vmatprep.subr.bf16.mxu0 %v1036_v16  ;;  %v1064_v52 = vld [vmem:[%s1351_s1 + $0x158] sm:$0xff]   ;;  %v1068_v56 = vld [vmem:[%s1351_s1 + $0x160] sm:$0xff]   ;;  %v21_v63 = vld [vmem:[%s1352_s0 + $0x48] sm:$0xff] }
  0x12   :  { %944 = vmatprep.subr.bf16.mxu1 %v1037_v17  ;;  %v1065_v53 = vld [vmem:[%s1351_s1 + $0x1d8] sm:$0xff]   ;;  %v1069_v57 = vld [vmem:[%s1351_s1 + $0x1e0] sm:$0xff]   ;;  %v25_v0 = vld [vmem:[%s1352_s0 + $0x68] sm:$0xff] }
  0x13   :  { %v1066_v54 = vld [vmem:[%s1351_s1 + $0x118] sm:$0xff]   ;;  %v1070_v58 = vld [vmem:[%s1351_s1 + $0x120] sm:$0xff]   ;;  %v839_v2 = vcombine.high %v21_v63, %v25_v0  ;;  %v1072_v3 = vld [vmem:[%s1351_s1 + $0x168] sm:$0xff]   ;;  %v838_v4 = vcombine.low %v21_v63, %v25_v0 }
  0x14   :  { %917 = vmatpush3.bf16.msra.mxu0 %v1038_v18  ;;  %v1067_v55 = vld [vmem:[%s1351_s1 + $0x198] sm:$0xff]   ;;  %v1071_v59 = vld [vmem:[%s1351_s1 + $0x1a0] sm:$0xff]   ;;  %v1073_v5 = vld [vmem:[%s1351_s1 + $0x1e8] sm:$0xff]  }
  0x15   :  { %945 = vmatpush3.bf16.msra.mxu1 %v1039_v19  ;;  %918 = vmatprep.subr.bf16.mxu0 %v1040_v20  ;;  %v20_v60 = vld [vmem:[%s1352_s0 + $0x40] sm:$0xff]  ;;  %v1074_v6 = vld [vmem:[%s1351_s1 + $0x128] sm:$0xff]   ;;  %v1076_v8 = vld [vmem:[%s1351_s1 + $0x170] sm:$0xff]  }
  0x16   :  { %946 = vmatprep.subr.bf16.mxu1 %v1041_v21  ;;  %v24_v61 = vld [vmem:[%s1352_s0 + $0x60] sm:$0xff]  ;;  %v1075_v7 = vld [vmem:[%s1351_s1 + $0x1a8] sm:$0xff]   ;;  %v1077_v9 = vld [vmem:[%s1351_s1 + $0x1f0] sm:$0xff]  }
  0x17   :  { %v837_v62 = vcombine.high %v20_v60, %v24_v61  ;;  %v836_v1 = vcombine.low %v20_v60, %v24_v61  ;;  %v1078_v10 = vld [vmem:[%s1351_s1 + $0x130] sm:$0xff]   ;;  %v1080_v12 = vld [vmem:[%s1351_s1 + $0x178] sm:$0xff]  }
  0x18   :  { %919 = vmatpush3.bf16.msra.mxu0 %v1042_v22  ;;  %v1079_v11 = vld [vmem:[%s1351_s1 + $0x1b0] sm:$0xff]   ;;  %v1081_v13 = vld [vmem:[%s1351_s1 + $0x1f8] sm:$0xff]  }
  0x19   :  { %947 = vmatpush3.bf16.msra.mxu1 %v1043_v23  ;;  %920 = vmatprep.subr.bf16.mxu0 %v1044_v24  ;;  %v1082_v14 = vld [vmem:[%s1351_s1 + $0x138] sm:$0xff]   ;;  %v14_v16 = vld [vmem:[%s1352_s0 + $0x10] sm:$0xff] }
  0x1a   :  { %948 = vmatprep.subr.bf16.mxu1 %v1045_v25  ;;  %v1083_v15 = vld [vmem:[%s1351_s1 + $0x1b8] sm:$0xff]   ;;  %v18_v17 = vld [vmem:[%s1352_s0 + $0x30] sm:$0xff] }
  0x1b   :  { %v15_v18 = vld [vmem:[%s1352_s0 + $0x18] sm:$0xff]  ;;  %v832_v20 = vcombine.low %v14_v16, %v18_v17  ;;  %v833_v21 = vcombine.high %v14_v16, %v18_v17  ;;  %v22_v24 = vld [vmem:[%s1352_s0 + $0x50] sm:$0xff] }
  0x1c   :  { %921 = vmatpush3.bf16.msra.mxu0 %v1046_v26  ;;  %v19_v19 = vld [vmem:[%s1352_s0 + $0x38] sm:$0xff]  ;;  %v26_v25 = vld [vmem:[%s1352_s0 + $0x70] sm:$0xff] }
  0x1d   :  { %949 = vmatpush3.bf16.msra.mxu1 %v1047_v27  ;;  %922 = vmatprep.subr.bf16.mxu0 %v1048_v28  ;;  %v834_v22 = vcombine.low %v15_v18, %v19_v19  ;;  %v835_v23 = vcombine.high %v15_v18, %v19_v19  ;;  %v23_v26 = vld [vmem:[%s1352_s0 + $0x58] sm:$0xff]  ;;  %v841_v27 = vcombine.high %v22_v24, %v26_v25 }
  0x1e   :  { %950 = vmatprep.subr.bf16.mxu1 %v1049_v29  ;;  %v27_v28 = vld [vmem:[%s1352_s0 + $0x78] sm:$0xff] }
  0x1f   :  { %v843_v29 = vcombine.high %v23_v26, %v27_v28 }
  0x20   :  { %923 = vmatpush3.bf16.msra.mxu0 %v1050_v30  ;;  %v840_v30 = vcombine.low %v22_v24, %v26_v25 }
  0x21   :  { %951 = vmatpush3.bf16.msra.mxu1 %v1051_v31  ;;  %964 = vmatprep.subr.bf16.mxu0 %v1052_v40  ;;  %v842_v31 = vcombine.low %v23_v26, %v27_v28 }
  0x22   :  { %992 = vmatprep.subr.bf16.mxu1 %v1053_v41 }
  0x23   :  { %653 = vmatmul.mubr.bf16.vlgmr.msra.gmra.mrb[0].mxu0 %v828_v35 }
  0x24   :  { %702 = vmatmul.mubr.bf16.vlgmr.msra.gmra.mrb[0].mxu1 %v830_v38  ;;  %965 = vmatpush3.bf16.msra.mxu0 %v1054_v42 }
  0x25   :  { %993 = vmatpush3.bf16.msra.mxu1 %v1055_v43  ;;  %966 = vmatprep.subr.bf16.mxu0 %v1056_v44 }
  0x26   :  { %994 = vmatprep.subr.bf16.mxu1 %v1057_v45  ;;  %660 = vmatprep.mubr.bf16.mxu0 %v837_v62 }
  0x27   :  { %709 = vmatprep.mubr.bf16.mxu1 %v839_v2 }
  0x28   :  { %967 = vmatpush3.bf16.msra.mxu0 %v1058_v46 }
  0x29   :  { %995 = vmatpush3.bf16.msra.mxu1 %v1059_v47  ;;  %968 = vmatprep.subr.bf16.mxu0 %v1060_v48 }
  0x2a   :  { %996 = vmatprep.subr.bf16.mxu1 %v1061_v49 }
  0x2b   :  { %661 = vmatmul.mubr.bf16.gmra.mrb[4].mxu0 %v836_v1 }
  0x2c   :  { %969 = vmatpush3.bf16.msra.mxu0 %v1062_v50  ;;  %710 = vmatmul.mubr.bf16.gmra.mrb[4].mxu1 %v838_v4 }
  0x2d   :  { %997 = vmatpush3.bf16.msra.mxu1 %v1063_v51  ;;  %970 = vmatprep.subr.bf16.mxu0 %v1064_v52 }
  0x2e   :  { %998 = vmatprep.subr.bf16.mxu1 %v1065_v53  ;;  %750 = vmatprep.mubr.bf16.mxu0 %v833_v21 }
  0x2f   :  { %799 = vmatprep.mubr.bf16.mxu1 %v835_v23 }
  0x30   :  { %971 = vmatpush3.bf16.msra.mxu0 %v1066_v54 }
  0x31   :  { %999 = vmatpush3.bf16.msra.mxu1 %v1067_v55  ;;  %972 = vmatprep.subr.bf16.mxu0 %v1068_v56 }
  0x32   :  { %1000 = vmatprep.subr.bf16.mxu1 %v1069_v57 }
  0x34   :  { %973 = vmatpush3.bf16.msra.mxu0 %v1070_v58 }
  0x35   :  { %1001 = vmatpush3.bf16.msra.mxu1 %v1071_v59  ;;  %974 = vmatprep.subr.bf16.mxu0 %v1072_v3 }
  0x36   :  { %1002 = vmatprep.subr.bf16.mxu1 %v1073_v5 }
  0x38   :  { %975 = vmatpush3.bf16.msra.mxu0 %v1074_v6 }
  0x39   :  { %1003 = vmatpush3.bf16.msra.mxu1 %v1075_v7  ;;  %976 = vmatprep.subr.bf16.mxu0 %v1076_v8 }
  0x3a   :  { %1004 = vmatprep.subr.bf16.mxu1 %v1077_v9 }
  0x3c   :  { %977 = vmatpush3.bf16.msra.mxu0 %v1078_v10 }
  0x3d   :  { %1005 = vmatpush3.bf16.msra.mxu1 %v1079_v11  ;;  %978 = vmatprep.subr.bf16.mxu0 %v1080_v12 }
  0x3e   :  { %1006 = vmatprep.subr.bf16.mxu1 %v1081_v13 }
  0x40   :  { %979 = vmatpush3.bf16.msra.mxu0 %v1082_v14 }
  0x41   :  { %1007 = vmatpush3.bf16.msra.mxu1 %v1083_v15 }
  0x43   :  { %751 = vmatmul.mubr.bf16.vlgmr.msra.gmra.mrb[8].mxu0 %v832_v20 }
  0x44   :  { %800 = vmatmul.mubr.bf16.vlgmr.msra.gmra.mrb[8].mxu1 %v834_v22  ;;  %758 = vmatprep.mubr.bf16.mxu0 %v841_v27 }
  0x45   :  { %807 = vmatprep.mubr.bf16.mxu1 %v843_v29 }
  0x4b   :  { %759 = vmatmul.mubr.bf16.gmra.mrb[12].mxu0 %v840_v30 }
  0x4c   :  { %808 = vmatmul.mubr.bf16.gmra.mrb[12].mxu1 %v842_v31 }
  0xf6   :  { %v924_v32 = vpop.f32.mrb[0].mxu0 }
  0xf7   :  { %v952_v33 = vpop.f32.mrb[0].mxu1  ;;  %v925_v34 = vpop.f32.mrb[1].mxu0 }
  0xf8   :  { %v926_v35 = vadd.f32 %v925_v34, %v924_v32  ;;  %v953_v36 = vpop.f32.mrb[1].mxu1  ;;  %v927_v37 = vpop.f32.mrb[2].mxu0 }
  0xf9   :  { %v954_v38 = vadd.f32 %v953_v36, %v952_v33  ;;  %v955_v39 = vpop.f32.mrb[2].mxu1  ;;  %v928_v40 = vpop.f32.mrb[3].mxu0 }
  0xfa   :  { %v929_v41 = vadd.f32 %v928_v40, %v927_v37  ;;  %v956_v42 = vpop.f32.mrb[3].mxu1 }
  0xfb   :  { %v704_v43 = vadd.f32 %v954_v38, %v926_v35  ;;  %v957_v44 = vadd.f32 %v956_v42, %v955_v39 }
  0xfd   :  { %v707_v45 = vadd.f32 %v957_v44, %v929_v41 }
  0xfe   :  { %v930_v46 = vpop.f32.mrb[4].mxu0 }
  0xff   :  { %v958_v47 = vpop.f32.mrb[4].mxu1  ;;  %v931_v48 = vpop.f32.mrb[5].mxu0 }
 0x100   :  { %v932_v49 = vadd.f32 %v931_v48, %v930_v46  ;;  %v959_v50 = vpop.f32.mrb[5].mxu1  ;;  %v933_v51 = vpop.f32.mrb[6].mxu0 }
 0x101   :  { %v960_v52 = vadd.f32 %v959_v50, %v958_v47  ;;  %v961_v53 = vpop.f32.mrb[6].mxu1  ;;  %v934_v54 = vpop.f32.mrb[7].mxu0 }
 0x102   :  { %v935_v55 = vadd.f32 %v934_v54, %v933_v51  ;;  %v962_v56 = vpop.f32.mrb[7].mxu1 }
 0x103   :  { %v712_v57 = vadd.f32 %v960_v52, %v932_v49  ;;  %v963_v58 = vadd.f32 %v962_v56, %v961_v53 }
 0x105   :  { %v715_v59 = vadd.f32 %v963_v58, %v935_v55 }
 0x116   :  { %v980_v60 = vpop.f32.mrb[8].mxu0 }
 0x117   :  { %v1008_v61 = vpop.f32.mrb[8].mxu1  ;;  %v981_v62 = vpop.f32.mrb[9].mxu0 }
 0x118   :  { %v1009_v63 = vpop.f32.mrb[9].mxu1  ;;  %v982_v0 = vadd.f32 %v981_v62, %v980_v60  ;;  %v983_v2 = vpop.f32.mrb[10].mxu0 }
 0x119   :  { %v1010_v1 = vadd.f32 %v1009_v63, %v1008_v61  ;;  %v1011_v3 = vpop.f32.mrb[10].mxu1  ;;  %v984_v4 = vpop.f32.mrb[11].mxu0 }
 0x11a   :  { %v1012_v5 = vpop.f32.mrb[11].mxu1  ;;  %v753_v6 = vadd.f32 %v982_v0, %v704_v43  ;;  %v985_v7 = vadd.f32 %v984_v4, %v983_v2 }
 0x11b   :  { %v1013_v8 = vadd.f32 %v1012_v5, %v1011_v3 }
 0x11c   :  { %v802_v9 = vadd.f32 %v1010_v1, %v753_v6  ;;  %v756_v10 = vadd.f32 %v985_v7, %v707_v45 }
 0x11e   :  { %v816_v11 = vmax.f32 %v802_v9, 0.0  ;;  %v805_v12 = vadd.f32 %v1013_v8, %v756_v10  ;;  %v986_v13 = vpop.f32.mrb[12].mxu0 }
 0x11f   :  { %v1014_v14 = vpop.f32.mrb[12].mxu1  ;;  %v987_v15 = vpop.f32.mrb[13].mxu0 }
 0x120   :  { %v1015_v16 = vpop.f32.mrb[13].mxu1  ;;  %820 = vst [vmem:[%s1353_s2] sm:$0xff] %v816_v11  ;;  %v817_v17 = vmax.f32 %v805_v12, 0.0  ;;  %v988_v18 = vadd.f32 %v987_v15, %v986_v13  ;;  %v989_v20 = vpop.f32.mrb[14].mxu0 }
 0x121   :  { %v1016_v19 = vadd.f32 %v1015_v16, %v1014_v14  ;;  %v1017_v21 = vpop.f32.mrb[14].mxu1  ;;  %v990_v22 = vpop.f32.mrb[15].mxu0 }
 0x122   :  { %v1018_v23 = vpop.f32.mrb[15].mxu1  ;;  %821 = vst [vmem:[%s1353_s2 + $0x8] sm:$0xff] %v817_v17  ;;  %v761_v24 = vadd.f32 %v988_v18, %v712_v57  ;;  %v991_v25 = vadd.f32 %v990_v22, %v989_v20 }
 0x123   :  { %v1019_v26 = vadd.f32 %v1018_v23, %v1017_v21 }
 0x124   :  { %v810_v27 = vadd.f32 %v1016_v19, %v761_v24  ;;  %v764_v28 = vadd.f32 %v991_v25, %v715_v59 }
 0x126   :  { %v818_v29 = vmax.f32 %v810_v27, 0.0  ;;  %v813_v30 = vadd.f32 %v1019_v26, %v764_v28 }
 0x128   :  { %822 = vst [vmem:[%s1353_s2 + $0x10] sm:$0xff] %v818_v29  ;;  %v819_v31 = vmax.f32 %v813_v30, 0.0 }
 0x12a   :  { %823 = vst [vmem:[%s1353_s2 + $0x18] sm:$0xff] %v819_v31 }

// kernel: encoder_forward.9
= control target key start
LH: loop header
LB: loop body
LE: loop exit
PB: predicated region body
PF: predicated region fallthrough
CT: control target
= control target key end

     0   :  { %vm2049_vm0 = vmmov 0   ;;  %s2505_s1 = inlined_call_operand.vmem [shape: bf16[2048,128], index: 1, kind: input, shape index: {}]   ;;  %s2506_s0 = inlined_call_operand.vmem [shape: bf16[8,2048], index: 0, kind: input, shape index: {}]   ;;  %s2507_s2 = inlined_call_operand.vmem [shape: bf16[128,128], index: 2, kind: input, shape index: {}]   ;;  %s2508_s3 = inlined_call_operand.vmem [shape: f32[8,128], index: 3, kind: output, shape index: {}]  }
   0x1   :  { %v1894_v0 = vld [vmem:[%s2505_s1 + $0x40] sm:$0xff]   ;;  %v1898_v4 = vld [vmem:[%s2505_s1 + $0x48] sm:$0xff]   ;;  %v1902_v8 = vld [vmem:[%s2505_s1 + $0x50] sm:$0xff]  }
   0x2   :  { %v1895_v1 = vld [vmem:[%s2505_s1 + $0xc0] sm:$0xff]   ;;  %1687 = vmatprep.subr.bf16.mxu0 %v1894_v0  ;;  %v1899_v5 = vld [vmem:[%s2505_s1 + $0xc8] sm:$0xff]   ;;  %v1903_v9 = vld [vmem:[%s2505_s1 + $0xd0] sm:$0xff]  }
   0x3   :  { %v1896_v2 = vld [vmem:[%s2505_s1] sm:$0xff]   ;;  %1709 = vmatprep.subr.bf16.mxu1 %v1895_v1  ;;  %v1900_v6 = vld [vmem:[%s2505_s1 + $0x8] sm:$0xff]   ;;  %v1904_v10 = vld [vmem:[%s2505_s1 + $0x10] sm:$0xff]  }
   0x4   :  { %v1897_v3 = vld [vmem:[%s2505_s1 + $0x80] sm:$0xff]   ;;  %1688 = vmatpush3.bf16.msra.mxu0 %v1896_v2  ;;  %v1901_v7 = vld [vmem:[%s2505_s1 + $0x88] sm:$0xff]   ;;  %v1905_v11 = vld [vmem:[%s2505_s1 + $0x90] sm:$0xff]  }
   0x5   :  { %1710 = vmatpush3.bf16.msra.mxu1 %v1897_v3  ;;  %1689 = vmatprep.subr.bf16.mxu0 %v1898_v4  ;;  %v1906_v12 = vld [vmem:[%s2505_s1 + $0x58] sm:$0xff]   ;;  %v1910_v16 = vld [vmem:[%s2505_s1 + $0x60] sm:$0xff]   ;;  %v1914_v20 = vld [vmem:[%s2505_s1 + $0x68] sm:$0xff]  }
   0x6   :  { %1711 = vmatprep.subr.bf16.mxu1 %v1899_v5  ;;  %v1907_v13 = vld [vmem:[%s2505_s1 + $0xd8] sm:$0xff]   ;;  %v1911_v17 = vld [vmem:[%s2505_s1 + $0xe0] sm:$0xff]   ;;  %v1915_v21 = vld [vmem:[%s2505_s1 + $0xe8] sm:$0xff]  }
   0x7   :  { %v1908_v14 = vld [vmem:[%s2505_s1 + $0x18] sm:$0xff]   ;;  %v1912_v18 = vld [vmem:[%s2505_s1 + $0x20] sm:$0xff]   ;;  %v1916_v22 = vld [vmem:[%s2505_s1 + $0x28] sm:$0xff]  }
   0x8   :  { %1690 = vmatpush3.bf16.msra.mxu0 %v1900_v6  ;;  %v1909_v15 = vld [vmem:[%s2505_s1 + $0x98] sm:$0xff]   ;;  %v1913_v19 = vld [vmem:[%s2505_s1 + $0xa0] sm:$0xff]   ;;  %v1917_v23 = vld [vmem:[%s2505_s1 + $0xa8] sm:$0xff]  }
   0x9   :  { %1712 = vmatpush3.bf16.msra.mxu1 %v1901_v7  ;;  %1691 = vmatprep.subr.bf16.mxu0 %v1902_v8  ;;  %v1918_v24 = vld [vmem:[%s2505_s1 + $0x70] sm:$0xff]   ;;  %v1922_v28 = vld [vmem:[%s2505_s1 + $0x78] sm:$0xff]   ;;  %v15_v32 = vld [vmem:[%s2506_s0] sm:$0xff] }
   0xa   :  { %1713 = vmatprep.subr.bf16.mxu1 %v1903_v9  ;;  %v1919_v25 = vld [vmem:[%s2505_s1 + $0xf0] sm:$0xff]   ;;  %v1923_v29 = vld [vmem:[%s2505_s1 + $0xf8] sm:$0xff]   ;;  %v16_v33 = vld [vmem:[%s2506_s0 + $0x8] sm:$0xff]  ;;  %v1535_v34 = vcombine.low %v15_v32, %v15_v32  ;;  %v1536_v35 = vcombine.high %v15_v32, %v15_v32 }
   0xb   :  { %v1920_v26 = vld [vmem:[%s2505_s1 + $0x30] sm:$0xff]   ;;  %v1924_v30 = vld [vmem:[%s2505_s1 + $0x38] sm:$0xff]   ;;  %v1537_v36 = vcombine.low %v16_v33, %v16_v33  ;;  %v1538_v37 = vcombine.high %v16_v33, %v16_v33  ;;  %v1930_v38 = vld [vmem:[%s2505_s1 + $0x140] sm:$0xff]  }
   0xc   :  { %1692 = vmatpush3.bf16.msra.mxu0 %v1904_v10  ;;  %v1921_v27 = vld [vmem:[%s2505_s1 + $0xb0] sm:$0xff]   ;;  %v1925_v31 = vld [vmem:[%s2505_s1 + $0xb8] sm:$0xff]   ;;  %v1931_v39 = vld [vmem:[%s2505_s1 + $0x1c0] sm:$0xff]   ;;  %1135 = vmatprep.mubr.bf16.mxu0 %v1536_v35 }
   0xd   :  { %1714 = vmatpush3.bf16.msra.mxu1 %v1905_v11  ;;  %1693 = vmatprep.subr.bf16.mxu0 %v1906_v12  ;;  %v1932_v40 = vld [vmem:[%s2505_s1 + $0x100] sm:$0xff]   ;;  %v1934_v42 = vld [vmem:[%s2505_s1 + $0x148] sm:$0xff]   ;;  %v1938_v46 = vld [vmem:[%s2505_s1 + $0x150] sm:$0xff]  }
   0xe   :  { %1715 = vmatprep.subr.bf16.mxu1 %v1907_v13  ;;  %1175 = vmatprep.mubr.bf16.mxu1 %v1538_v37  ;;  %v1933_v41 = vld [vmem:[%s2505_s1 + $0x180] sm:$0xff]   ;;  %v1935_v43 = vld [vmem:[%s2505_s1 + $0x1c8] sm:$0xff]   ;;  %v1939_v47 = vld [vmem:[%s2505_s1 + $0x1d0] sm:$0xff]  }
   0xf   :  { %v1936_v44 = vld [vmem:[%s2505_s1 + $0x108] sm:$0xff]   ;;  %v1940_v48 = vld [vmem:[%s2505_s1 + $0x110] sm:$0xff]   ;;  %v1942_v50 = vld [vmem:[%s2505_s1 + $0x158] sm:$0xff]  }
  0x10   :  { %1694 = vmatpush3.bf16.msra.mxu0 %v1908_v14  ;;  %v1937_v45 = vld [vmem:[%s2505_s1 + $0x188] sm:$0xff]   ;;  %v1941_v49 = vld [vmem:[%s2505_s1 + $0x190] sm:$0xff]   ;;  %v1943_v51 = vld [vmem:[%s2505_s1 + $0x1d8] sm:$0xff]  }
  0x11   :  { %1716 = vmatpush3.bf16.msra.mxu1 %v1909_v15  ;;  %1695 = vmatprep.subr.bf16.mxu0 %v1910_v16  ;;  %v1944_v52 = vld [vmem:[%s2505_s1 + $0x118] sm:$0xff]   ;;  %v1946_v54 = vld [vmem:[%s2505_s1 + $0x160] sm:$0xff]   ;;  %v1950_v58 = vld [vmem:[%s2505_s1 + $0x168] sm:$0xff]  }
  0x12   :  { %1717 = vmatprep.subr.bf16.mxu1 %v1911_v17  ;;  %v1945_v53 = vld [vmem:[%s2505_s1 + $0x198] sm:$0xff]   ;;  %v1947_v55 = vld [vmem:[%s2505_s1 + $0x1e0] sm:$0xff]   ;;  %v1951_v59 = vld [vmem:[%s2505_s1 + $0x1e8] sm:$0xff]  }
  0x13   :  { %v1948_v56 = vld [vmem:[%s2505_s1 + $0x120] sm:$0xff]   ;;  %v1952_v60 = vld [vmem:[%s2505_s1 + $0x128] sm:$0xff]   ;;  %v1954_v62 = vld [vmem:[%s2505_s1 + $0x170] sm:$0xff]  }
  0x14   :  { %1696 = vmatpush3.bf16.msra.mxu0 %v1912_v18  ;;  %v1949_v57 = vld [vmem:[%s2505_s1 + $0x1a0] sm:$0xff]   ;;  %v1953_v61 = vld [vmem:[%s2505_s1 + $0x1a8] sm:$0xff]   ;;  %v1955_v63 = vld [vmem:[%s2505_s1 + $0x1f0] sm:$0xff]  }
  0x15   :  { %1718 = vmatpush3.bf16.msra.mxu1 %v1913_v19  ;;  %1697 = vmatprep.subr.bf16.mxu0 %v1914_v20  ;;  %v1956_v0 = vld [vmem:[%s2505_s1 + $0x130] sm:$0xff]   ;;  %v1958_v2 = vld [vmem:[%s2505_s1 + $0x178] sm:$0xff]   ;;  %v1966_v12 = vld [vmem:[%s2505_s1 + $0x240] sm:$0xff]  }
  0x16   :  { %1719 = vmatprep.subr.bf16.mxu1 %v1915_v21  ;;  %v1957_v1 = vld [vmem:[%s2505_s1 + $0x1b0] sm:$0xff]   ;;  %v1959_v3 = vld [vmem:[%s2505_s1 + $0x1f8] sm:$0xff]   ;;  %v1967_v13 = vld [vmem:[%s2505_s1 + $0x2c0] sm:$0xff]  }
  0x17   :  { %v1960_v4 = vld [vmem:[%s2505_s1 + $0x138] sm:$0xff]   ;;  %v17_v6 = vld [vmem:[%s2506_s0 + $0x10] sm:$0xff]  ;;  %v1968_v14 = vld [vmem:[%s2505_s1 + $0x200] sm:$0xff]  }
  0x18   :  { %1698 = vmatpush3.bf16.msra.mxu0 %v1916_v22  ;;  %v1961_v5 = vld [vmem:[%s2505_s1 + $0x1b8] sm:$0xff]   ;;  %v1539_v7 = vcombine.low %v17_v6, %v17_v6  ;;  %v1540_v8 = vcombine.high %v17_v6, %v17_v6  ;;  %v1969_v15 = vld [vmem:[%s2505_s1 + $0x280] sm:$0xff]   ;;  %v1970_v16 = vld [vmem:[%s2505_s1 + $0x248] sm:$0xff]  }
  0x19   :  { %1720 = vmatpush3.bf16.msra.mxu1 %v1917_v23  ;;  %1699 = vmatprep.subr.bf16.mxu0 %v1918_v24  ;;  %v18_v9 = vld [vmem:[%s2506_s0 + $0x18] sm:$0xff]  ;;  %v1971_v17 = vld [vmem:[%s2505_s1 + $0x2c8] sm:$0xff]   ;;  %v1974_v20 = vld [vmem:[%s2505_s1 + $0x250] sm:$0xff]  }
  0x1a   :  { %1721 = vmatprep.subr.bf16.mxu1 %v1919_v25  ;;  %v1541_v10 = vcombine.low %v18_v9, %v18_v9  ;;  %v1542_v11 = vcombine.high %v18_v9, %v18_v9  ;;  %v1972_v18 = vld [vmem:[%s2505_s1 + $0x208] sm:$0xff]   ;;  %v1975_v21 = vld [vmem:[%s2505_s1 + $0x2d0] sm:$0xff]   ;;  %v1978_v24 = vld [vmem:[%s2505_s1 + $0x258] sm:$0xff]  }
  0x1b   :  { %v1973_v19 = vld [vmem:[%s2505_s1 + $0x288] sm:$0xff]   ;;  %v1976_v22 = vld [vmem:[%s2505_s1 + $0x210] sm:$0xff]   ;;  %v1979_v25 = vld [vmem:[%s2505_s1 + $0x2d8] sm:$0xff]  }
  0x1c   :  { %1700 = vmatpush3.bf16.msra.mxu0 %v1920_v26  ;;  %v1977_v23 = vld [vmem:[%s2505_s1 + $0x290] sm:$0xff]   ;;  %v1980_v26 = vld [vmem:[%s2505_s1 + $0x218] sm:$0xff]   ;;  %v1986_v32 = vld [vmem:[%s2505_s1 + $0x268] sm:$0xff]  }
  0x1d   :  { %1722 = vmatpush3.bf16.msra.mxu1 %v1921_v27  ;;  %1701 = vmatprep.subr.bf16.mxu0 %v1922_v28  ;;  %v1981_v27 = vld [vmem:[%s2505_s1 + $0x298] sm:$0xff]   ;;  %v1982_v28 = vld [vmem:[%s2505_s1 + $0x260] sm:$0xff]   ;;  %v1987_v33 = vld [vmem:[%s2505_s1 + $0x2e8] sm:$0xff]  }
  0x1e   :  { %1723 = vmatprep.subr.bf16.mxu1 %v1923_v29  ;;  %v1983_v29 = vld [vmem:[%s2505_s1 + $0x2e0] sm:$0xff]   ;;  %v1989_v35 = vld [vmem:[%s2505_s1 + $0x2a8] sm:$0xff]   ;;  %v1991_v37 = vld [vmem:[%s2505_s1 + $0x2f0] sm:$0xff]  }
  0x1f   :  { %v2022_v6 = vld [vmem:[%s2505_s1 + $0x368] sm:$0xff]  }
  0x20   :  { %1702 = vmatpush3.bf16.msra.mxu0 %v1924_v30  ;;  %v1984_v30 = vld [vmem:[%s2505_s1 + $0x220] sm:$0xff]   ;;  %v2025_v9 = vld [vmem:[%s2505_s1 + $0x3a8] sm:$0xff]  }
  0x21   :  { %1724 = vmatpush3.bf16.msra.mxu1 %v1925_v31  ;;  %1731 = vmatprep.subr.bf16.mxu0 %v1930_v38  ;;  %v1985_v31 = vld [vmem:[%s2505_s1 + $0x2a0] sm:$0xff]   ;;  %v1992_v38 = vld [vmem:[%s2505_s1 + $0x230] sm:$0xff]  }
  0x22   :  { %1753 = vmatprep.subr.bf16.mxu1 %v1931_v39  ;;  %v1993_v39 = vld [vmem:[%s2505_s1 + $0x2b0] sm:$0xff]  }
  0x23   :  { %1136 = vmatmul.mubr.bf16.vlgmr.msra.gmra.mrb[0].mxu0 %v1535_v34  ;;  %v1988_v34 = vld [vmem:[%s2505_s1 + $0x228] sm:$0xff]  }
  0x24   :  { %1176 = vmatmul.mubr.bf16.vlgmr.msra.gmra.mrb[0].mxu1 %v1537_v36  ;;  %1732 = vmatpush3.bf16.msra.mxu0 %v1932_v40  ;;  %v1990_v36 = vld [vmem:[%s2505_s1 + $0x270] sm:$0xff]   ;;  %v1994_v40 = vld [vmem:[%s2505_s1 + $0x278] sm:$0xff]  }
  0x25   :  { %1754 = vmatpush3.bf16.msra.mxu1 %v1933_v41  ;;  %1733 = vmatprep.subr.bf16.mxu0 %v1934_v42  ;;  %v1995_v41 = vld [vmem:[%s2505_s1 + $0x2f8] sm:$0xff]  }
  0x26   :  { %1755 = vmatprep.subr.bf16.mxu1 %v1935_v43  ;;  %1215 = vmatprep.mubr.bf16.mxu0 %v1540_v8  ;;  %v1996_v42 = vld [vmem:[%s2505_s1 + $0x238] sm:$0xff]   ;;  %v2024_v8 = vld [vmem:[%s2505_s1 + $0x328] sm:$0xff]  }
  0x27   :  { %1255 = vmatprep.mubr.bf16.mxu1 %v1542_v11  ;;  %v1997_v43 = vld [vmem:[%s2505_s1 + $0x2b8] sm:$0xff]   ;;  %v2027_v11 = vld [vmem:[%s2505_s1 + $0x3f0] sm:$0xff]  }
  0x28   :  { %1734 = vmatpush3.bf16.msra.mxu0 %v1936_v44  ;;  %v19_v44 = vld [vmem:[%s2506_s0 + $0x20] sm:$0xff] }
  0x29   :  { %1756 = vmatpush3.bf16.msra.mxu1 %v1937_v45  ;;  %1735 = vmatprep.subr.bf16.mxu0 %v1938_v46  ;;  %v20_v45 = vld [vmem:[%s2506_s0 + $0x28] sm:$0xff]  ;;  %v1543_v46 = vcombine.low %v19_v44, %v19_v44 }
  0x2a   :  { %1757 = vmatprep.subr.bf16.mxu1 %v1939_v47  ;;  %v1544_v47 = vcombine.high %v19_v44, %v19_v44 }
  0x2c   :  { %1736 = vmatpush3.bf16.msra.mxu0 %v1940_v48  ;;  %v1545_v48 = vcombine.low %v20_v45, %v20_v45 }
  0x2d   :  { %1758 = vmatpush3.bf16.msra.mxu1 %v1941_v49  ;;  %1737 = vmatprep.subr.bf16.mxu0 %v1942_v50  ;;  %v1546_v49 = vcombine.high %v20_v45, %v20_v45  ;;  %v2002_v50 = vld [vmem:[%s2505_s1 + $0x340] sm:$0xff]  }
  0x2e   :  { %1759 = vmatprep.subr.bf16.mxu1 %v1943_v51  ;;  %v2003_v51 = vld [vmem:[%s2505_s1 + $0x3c0] sm:$0xff]  }
  0x30   :  { %1738 = vmatpush3.bf16.msra.mxu0 %v1944_v52  ;;  %v2004_v52 = vld [vmem:[%s2505_s1 + $0x300] sm:$0xff]  }
  0x31   :  { %1760 = vmatpush3.bf16.msra.mxu1 %v1945_v53  ;;  %1739 = vmatprep.subr.bf16.mxu0 %v1946_v54  ;;  %v2005_v53 = vld [vmem:[%s2505_s1 + $0x380] sm:$0xff]   ;;  %v2006_v54 = vld [vmem:[%s2505_s1 + $0x348] sm:$0xff]  }
  0x32   :  { %1761 = vmatprep.subr.bf16.mxu1 %v1947_v55  ;;  %v2007_v55 = vld [vmem:[%s2505_s1 + $0x3c8] sm:$0xff]  }
  0x34   :  { %1740 = vmatpush3.bf16.msra.mxu0 %v1948_v56  ;;  %v2008_v56 = vld [vmem:[%s2505_s1 + $0x308] sm:$0xff]  }
  0x35   :  { %1762 = vmatpush3.bf16.msra.mxu1 %v1949_v57  ;;  %1741 = vmatprep.subr.bf16.mxu0 %v1950_v58  ;;  %v2009_v57 = vld [vmem:[%s2505_s1 + $0x388] sm:$0xff]   ;;  %v2010_v58 = vld [vmem:[%s2505_s1 + $0x350] sm:$0xff]  }
  0x36   :  { %1763 = vmatprep.subr.bf16.mxu1 %v1951_v59  ;;  %v2011_v59 = vld [vmem:[%s2505_s1 + $0x3d0] sm:$0xff]  }
  0x38   :  { %1742 = vmatpush3.bf16.msra.mxu0 %v1952_v60  ;;  %v2012_v60 = vld [vmem:[%s2505_s1 + $0x310] sm:$0xff]  }
  0x39   :  { %1764 = vmatpush3.bf16.msra.mxu1 %v1953_v61  ;;  %1743 = vmatprep.subr.bf16.mxu0 %v1954_v62  ;;  %v2013_v61 = vld [vmem:[%s2505_s1 + $0x390] sm:$0xff]   ;;  %v2014_v62 = vld [vmem:[%s2505_s1 + $0x358] sm:$0xff]  }
  0x3a   :  { %1765 = vmatprep.subr.bf16.mxu1 %v1955_v63  ;;  %v2015_v63 = vld [vmem:[%s2505_s1 + $0x3d8] sm:$0xff]  }
  0x3c   :  { %1744 = vmatpush3.bf16.msra.mxu0 %v1956_v0  ;;  %v2016_v0 = vld [vmem:[%s2505_s1 + $0x318] sm:$0xff]  }
  0x3d   :  { %1766 = vmatpush3.bf16.msra.mxu1 %v1957_v1  ;;  %1745 = vmatprep.subr.bf16.mxu0 %v1958_v2  ;;  %v2017_v1 = vld [vmem:[%s2505_s1 + $0x398] sm:$0xff]   ;;  %v2018_v2 = vld [vmem:[%s2505_s1 + $0x360] sm:$0xff]  }
  0x3e   :  { %1767 = vmatprep.subr.bf16.mxu1 %v1959_v3  ;;  %v2019_v3 = vld [vmem:[%s2505_s1 + $0x3e0] sm:$0xff]  }
  0x40   :  { %1746 = vmatpush3.bf16.msra.mxu0 %v1960_v4  ;;  %v2020_v4 = vld [vmem:[%s2505_s1 + $0x320] sm:$0xff]  }
  0x41   :  { %1768 = vmatpush3.bf16.msra.mxu1 %v1961_v5  ;;  %1775 = vmatprep.subr.bf16.mxu0 %v1966_v12  ;;  %v2021_v5 = vld [vmem:[%s2505_s1 + $0x3a0] sm:$0xff]   ;;  %v2028_v12 = vld [vmem:[%s2505_s1 + $0x330] sm:$0xff]  }
  0x42   :  { %1797 = vmatprep.subr.bf16.mxu1 %v1967_v13  ;;  %v2029_v13 = vld [vmem:[%s2505_s1 + $0x3b0] sm:$0xff]  }
  0x43   :  { %1216 = vmatmul.mubr.bf16.vlgmr.msra.gmra.mrb[4].mxu0 %v1539_v7  ;;  %v2023_v7 = vld [vmem:[%s2505_s1 + $0x3e8] sm:$0xff]  }
  0x44   :  { %1256 = vmatmul.mubr.bf16.vlgmr.msra.gmra.mrb[4].mxu1 %v1541_v10  ;;  %1776 = vmatpush3.bf16.msra.mxu0 %v1968_v14  ;;  %v2026_v10 = vld [vmem:[%s2505_s1 + $0x370] sm:$0xff]   ;;  %v2030_v14 = vld [vmem:[%s2505_s1 + $0x378] sm:$0xff]  }
  0x45   :  { %1798 = vmatpush3.bf16.msra.mxu1 %v1969_v15  ;;  %1777 = vmatprep.subr.bf16.mxu0 %v1970_v16  ;;  %v2031_v15 = vld [vmem:[%s2505_s1 + $0x3f8] sm:$0xff]  }
  0x46   :  { %1799 = vmatprep.subr.bf16.mxu1 %v1971_v17  ;;  %1295 = vmatprep.mubr.bf16.mxu0 %v1544_v47  ;;  %v2032_v16 = vld [vmem:[%s2505_s1 + $0x338] sm:$0xff]  }
  0x47   :  { %1335 = vmatprep.mubr.bf16.mxu1 %v1546_v49  ;;  %v2033_v17 = vld [vmem:[%s2505_s1 + $0x3b8] sm:$0xff]  }
  0x48   :  { %1778 = vmatpush3.bf16.msra.mxu0 %v1972_v18  ;;  %v21_v18 = vld [vmem:[%s2506_s0 + $0x30] sm:$0xff] }
  0x49   :  { %1800 = vmatpush3.bf16.msra.mxu1 %v1973_v19  ;;  %1779 = vmatprep.subr.bf16.mxu0 %v1974_v20  ;;  %v22_v19 = vld [vmem:[%s2506_s0 + $0x38] sm:$0xff]  ;;  %v1547_v20 = vcombine.low %v21_v18, %v21_v18 }
  0x4a   :  { %1801 = vmatprep.subr.bf16.mxu1 %v1975_v21  ;;  %v1548_v21 = vcombine.high %v21_v18, %v21_v18 }
  0x4c   :  { %1780 = vmatpush3.bf16.msra.mxu0 %v1976_v22  ;;  %v1549_v22 = vcombine.low %v22_v19, %v22_v19 }
  0x4d   :  { %1802 = vmatpush3.bf16.msra.mxu1 %v1977_v23  ;;  %1781 = vmatprep.subr.bf16.mxu0 %v1978_v24  ;;  %v1550_v23 = vcombine.high %v22_v19, %v22_v19  ;;  %v2048_v24 = vmov 0.0  }
  0x4e   :  { %1803 = vmatprep.subr.bf16.mxu1 %v1979_v25  ;;  %v2038_v25 = vld [vmem:[%s2507_s2] sm:$0xff]  }
  0x50   :  { %1782 = vmatpush3.bf16.msra.mxu0 %v1980_v26  ;;  %v2039_v26 = vld [vmem:[%s2507_s2 + $0x8] sm:$0xff]  }
  0x51   :  { %1804 = vmatpush3.bf16.msra.mxu1 %v1981_v27  ;;  %1783 = vmatprep.subr.bf16.mxu0 %v1982_v28  ;;  %v2040_v27 = vld [vmem:[%s2507_s2 + $0x10] sm:$0xff]   ;;  %v2041_v28 = vld [vmem:[%s2507_s2 + $0x18] sm:$0xff]  }
  0x52   :  { %1805 = vmatprep.subr.bf16.mxu1 %v1983_v29  ;;  %v2042_v29 = vld [vmem:[%s2507_s2 + $0x20] sm:$0xff]  }
  0x54   :  { %1784 = vmatpush3.bf16.msra.mxu0 %v1984_v30  ;;  %v2043_v30 = vld [vmem:[%s2507_s2 + $0x28] sm:$0xff]  }
  0x55   :  { %1806 = vmatpush3.bf16.msra.mxu1 %v1985_v31  ;;  %1785 = vmatprep.subr.bf16.mxu0 %v1986_v32  ;;  %v2044_v31 = vld [vmem:[%s2507_s2 + $0x30] sm:$0xff]   ;;  %v2045_v32 = vld [vmem:[%s2507_s2 + $0x38] sm:$0xff]  }
  0x56   :  { %1807 = vmatprep.subr.bf16.mxu1 %v1987_v33 }
  0x58   :  { %1786 = vmatpush3.bf16.msra.mxu0 %v1988_v34 }
  0x59   :  { %1808 = vmatpush3.bf16.msra.mxu1 %v1989_v35  ;;  %1787 = vmatprep.subr.bf16.mxu0 %v1990_v36 }
  0x5a   :  { %1809 = vmatprep.subr.bf16.mxu1 %v1991_v37 }
  0x5c   :  { %1788 = vmatpush3.bf16.msra.mxu0 %v1992_v38 }
  0x5d   :  { %1810 = vmatpush3.bf16.msra.mxu1 %v1993_v39  ;;  %1789 = vmatprep.subr.bf16.mxu0 %v1994_v40 }
  0x5e   :  { %1811 = vmatprep.subr.bf16.mxu1 %v1995_v41 }
  0x60   :  { %1790 = vmatpush3.bf16.msra.mxu0 %v1996_v42 }
  0x61   :  { %1812 = vmatpush3.bf16.msra.mxu1 %v1997_v43  ;;  %1819 = vmatprep.subr.bf16.mxu0 %v2002_v50 }
  0x62   :  { %1841 = vmatprep.subr.bf16.mxu1 %v2003_v51 }
  0x63   :  { %1296 = vmatmul.mubr.bf16.vlgmr.msra.gmra.mrb[8].mxu0 %v1543_v46 }
  0x64   :  { %1336 = vmatmul.mubr.bf16.vlgmr.msra.gmra.mrb[8].mxu1 %v1545_v48  ;;  %1820 = vmatpush3.bf16.msra.mxu0 %v2004_v52 }
  0x65   :  { %1842 = vmatpush3.bf16.msra.mxu1 %v2005_v53  ;;  %1821 = vmatprep.subr.bf16.mxu0 %v2006_v54 }
  0x66   :  { %1843 = vmatprep.subr.bf16.mxu1 %v2007_v55  ;;  %1375 = vmatprep.mubr.bf16.mxu0 %v1548_v21 }
  0x67   :  { %1415 = vmatprep.mubr.bf16.mxu1 %v1550_v23 }
  0x68   :  { %1822 = vmatpush3.bf16.msra.mxu0 %v2008_v56 }
  0x69   :  { %1844 = vmatpush3.bf16.msra.mxu1 %v2009_v57  ;;  %1823 = vmatprep.subr.bf16.mxu0 %v2010_v58 }
  0x6a   :  { %1845 = vmatprep.subr.bf16.mxu1 %v2011_v59 }
  0x6c   :  { %1824 = vmatpush3.bf16.msra.mxu0 %v2012_v60 }
  0x6d   :  { %1846 = vmatpush3.bf16.msra.mxu1 %v2013_v61  ;;  %1825 = vmatprep.subr.bf16.mxu0 %v2014_v62 }
  0x6e   :  { %1847 = vmatprep.subr.bf16.mxu1 %v2015_v63 }
  0x70   :  { %1826 = vmatpush3.bf16.msra.mxu0 %v2016_v0 }
  0x71   :  { %1848 = vmatpush3.bf16.msra.mxu1 %v2017_v1  ;;  %1827 = vmatprep.subr.bf16.mxu0 %v2018_v2 }
  0x72   :  { %1849 = vmatprep.subr.bf16.mxu1 %v2019_v3 }
  0x74   :  { %1828 = vmatpush3.bf16.msra.mxu0 %v2020_v4 }
  0x75   :  { %1850 = vmatpush3.bf16.msra.mxu1 %v2021_v5  ;;  %1829 = vmatprep.subr.bf16.mxu0 %v2022_v6 }
  0x76   :  { %1851 = vmatprep.subr.bf16.mxu1 %v2023_v7 }
  0x78   :  { %1830 = vmatpush3.bf16.msra.mxu0 %v2024_v8 }
  0x79   :  { %1852 = vmatpush3.bf16.msra.mxu1 %v2025_v9  ;;  %1831 = vmatprep.subr.bf16.mxu0 %v2026_v10 }
  0x7a   :  { %1853 = vmatprep.subr.bf16.mxu1 %v2027_v11 }
  0x7c   :  { %1832 = vmatpush3.bf16.msra.mxu0 %v2028_v12 }
  0x7d   :  { %1854 = vmatpush3.bf16.msra.mxu1 %v2029_v13  ;;  %1833 = vmatprep.subr.bf16.mxu0 %v2030_v14 }
  0x7e   :  { %1855 = vmatprep.subr.bf16.mxu1 %v2031_v15 }
  0x80   :  { %1834 = vmatpush3.bf16.msra.mxu0 %v2032_v16 }
  0x81   :  { %1856 = vmatpush3.bf16.msra.mxu1 %v2033_v17  ;;  %1872 = vmatprep.subr.bf16.mxu0 %v2048_v24 }
  0x83   :  { %1376 = vmatmul.mubr.bf16.vlgmr.msra.gmra.mrb[12].mxu0 %v1547_v20 }
  0x84   :  { %1416 = vmatmul.mubr.bf16.vlgmr.msra.gmra.mrb[12].mxu1 %v1549_v22  ;;  %1873 = vmatpush3.bf16.msra.mxu0 %v2038_v25 }
  0x85   :  { %1874 = vmatprep.subr.bf16.mxu0 %v2048_v24  ;;  %1888 = vmatprep.mubr.msk.bf16.mxu0 %vm2049_vm0, %v2048_v24 }
  0x88   :  { %1875 = vmatpush3.bf16.msra.mxu0 %v2039_v26 }
  0x89   :  { %1876 = vmatprep.subr.bf16.mxu0 %v2048_v24 }
  0x8c   :  { %1877 = vmatpush3.bf16.msra.mxu0 %v2040_v27 }
  0x8d   :  { %1878 = vmatprep.subr.bf16.mxu0 %v2048_v24 }
  0x90   :  { %1879 = vmatpush3.bf16.msra.mxu0 %v2041_v28 }
  0x91   :  { %1880 = vmatprep.subr.bf16.mxu0 %v2048_v24 }
  0x94   :  { %1881 = vmatpush3.bf16.msra.mxu0 %v2042_v29 }
  0x95   :  { %1882 = vmatprep.subr.bf16.mxu0 %v2048_v24 }
  0x98   :  { %1883 = vmatpush3.bf16.msra.mxu0 %v2043_v30 }
  0x99   :  { %1884 = vmatprep.subr.bf16.mxu0 %v2048_v24 }
  0x9c   :  { %1885 = vmatpush3.bf16.msra.mxu0 %v2044_v31 }
  0x9d   :  { %1886 = vmatprep.subr.bf16.mxu0 %v2048_v24 }
  0xa0   :  { %1887 = vmatpush3.bf16.msra.mxu0 %v2045_v32 }
  0xf6   :  { %v1703_v33 = vpop.f32.mrb[0].mxu0 }
  0xf7   :  { %v1725_v34 = vpop.f32.mrb[0].mxu1  ;;  %v1704_v35 = vpop.f32.mrb[1].mxu0 }
  0xf8   :  { %v1726_v36 = vpop.f32.mrb[1].mxu1  ;;  %v1705_v37 = vadd.f32 %v1704_v35, %v1703_v33  ;;  %v1706_v39 = vpop.f32.mrb[2].mxu0 }
  0xf9   :  { %v1727_v38 = vadd.f32 %v1726_v36, %v1725_v34  ;;  %v1728_v40 = vpop.f32.mrb[2].mxu1  ;;  %v1707_v41 = vpop.f32.mrb[3].mxu0 }
  0xfa   :  { %v1729_v42 = vpop.f32.mrb[3].mxu1 }
  0xfb   :  { %v1178_v43 = vadd.f32 %v1727_v38, %v1705_v37 }
 0x116   :  { %v1747_v44 = vpop.f32.mrb[4].mxu0 }
 0x117   :  { %v1769_v45 = vpop.f32.mrb[4].mxu1  ;;  %v1748_v46 = vpop.f32.mrb[5].mxu0 }
 0x118   :  { %v1770_v47 = vpop.f32.mrb[5].mxu1  ;;  %v1749_v48 = vadd.f32 %v1748_v46, %v1747_v44  ;;  %v1750_v50 = vpop.f32.mrb[6].mxu0 }
 0x119   :  { %v1771_v49 = vadd.f32 %v1770_v47, %v1769_v45  ;;  %v1772_v51 = vpop.f32.mrb[6].mxu1  ;;  %v1751_v52 = vpop.f32.mrb[7].mxu0 }
 0x11a   :  { %v1773_v53 = vpop.f32.mrb[7].mxu1  ;;  %v1218_v54 = vadd.f32 %v1749_v48, %v1178_v43 }
 0x11c   :  { %v1258_v55 = vadd.f32 %v1771_v49, %v1218_v54 }
 0x136   :  { %v1791_v56 = vpop.f32.mrb[8].mxu0 }
 0x137   :  { %v1813_v57 = vpop.f32.mrb[8].mxu1  ;;  %v1792_v58 = vpop.f32.mrb[9].mxu0 }
 0x138   :  { %v1793_v59 = vadd.f32 %v1792_v58, %v1791_v56  ;;  %v1814_v60 = vpop.f32.mrb[9].mxu1  ;;  %v1794_v61 = vpop.f32.mrb[10].mxu0 }
 0x139   :  { %v1815_v62 = vadd.f32 %v1814_v60, %v1813_v57  ;;  %v1816_v63 = vpop.f32.mrb[10].mxu1  ;;  %v1795_v0 = vpop.f32.mrb[11].mxu0 }
 0x13a   :  { %v1298_v1 = vadd.f32 %v1793_v59, %v1258_v55  ;;  %v1817_v2 = vpop.f32.mrb[11].mxu1 }
 0x13c   :  { %v1338_v3 = vadd.f32 %v1815_v62, %v1298_v1 }
 0x156   :  { %v1835_v4 = vpop.f32.mrb[12].mxu0 }
 0x157   :  { %v1857_v5 = vpop.f32.mrb[12].mxu1  ;;  %v1836_v6 = vpop.f32.mrb[13].mxu0 }
 0x158   :  { %v1837_v7 = vadd.f32 %v1836_v6, %v1835_v4  ;;  %v1858_v8 = vpop.f32.mrb[13].mxu1  ;;  %v1838_v9 = vpop.f32.mrb[14].mxu0 }
 0x159   :  { %v1859_v10 = vadd.f32 %v1858_v8, %v1857_v5  ;;  %v1860_v11 = vpop.f32.mrb[14].mxu1  ;;  %v1839_v12 = vpop.f32.mrb[15].mxu0 }
 0x15a   :  { %v1378_v13 = vadd.f32 %v1837_v7, %v1338_v3  ;;  %v1861_v14 = vpop.f32.mrb[15].mxu1 }
 0x15c   :  { %v1418_v15 = vadd.f32 %v1859_v10, %v1378_v13 }
 0x15e   :  { %v1423_v16 = vmax.f32 %v1418_v15, 0.0 }
 0x160   :  { %v1424_v17 = vpack.c.bf16 %v1423_v16, %v1423_v16 }
 0x162   :  { %1889 = vmatmul.mubr.bf16.vlgmr.msra.gmra.mrb[16].mxu0 %v1424_v17 }
 0x235   :  { %v1523_v18 = vpop.f32.mrb[16].mxu0 }
 0x236   :  { %2046 = vtanh.f32 %v1523_v18  ;;  %v1890_v19 = vpop.f32.mrb[17].mxu0 }
 0x237   :  { %v1526_v20 = vpop.f32.mrb[18].mxu0 }
 0x238   :  { %v1891_v21 = vpop.f32.mrb[19].mxu0 }
 0x240   :  { %v2047_v22 = vpop.eup %2046 }
 0x241   :  { %1530 = vst [vmem:[%s2508_s3] sm:$0xff] %v2047_v22 }

</bundles_post_ra>
